<compile_context>
chip_gen: v7x
topology: tpu7x:2x2x1
jax: 0.10.0
libtpu: 0.0.40
codegen_flags: <defaults>
</compile_context>

<pallas_src>
import functools
import math

import jax
import jax.numpy as jnp
from jax.experimental import pallas as pl
from jax.experimental.pallas import tpu as pltpu


def mha_kernel(x_ref, wqkv_ref, bqkv_ref, wp_ref, bp_ref, o_ref, *,
               num_heads, emb_size, seq_len, batch_tile):
    """One grid step processes `batch_tile` batch elements, fully fused."""
    H, E, N, Bt = num_heads, emb_size, seq_len, batch_tile
    D = E // H
    inv_scale = 1.0 / (E ** 0.5)  # module scales by sqrt(emb_size), keep that.

    # (Bt, N, E) -> (Bt*N, E) row slab; bf16 operands for the MXU.
    x = x_ref[...].reshape(Bt * N, E).astype(jnp.bfloat16)

    # Fused QKV projection: one wide bf16 matmul, f32 accumulation, f32 bias.
    qkv = jnp.dot(x, wqkv_ref[...], preferred_element_type=jnp.float32)
    qkv = qkv + bqkv_ref[...]                       # (Bt*N, 3E) f32

    q = qkv[:, 0 * E:1 * E] * inv_scale             # fold 1/sqrt(E) into q
    k = qkv[:, 1 * E:2 * E]
    v = qkv[:, 2 * E:3 * E]

    qb = q.astype(jnp.bfloat16)
    kb = k.astype(jnp.bfloat16)
    vb = v.astype(jnp.bfloat16)

    wp = wp_ref[...]                                # (E, E) bf16, loaded once
    bp = bp_ref[...]                                # (1, E) f32

    # Small static loops (Bt, H are small compile-time constants) — unrolled.
    for b in range(Bt):
        r0, r1 = b * N, (b + 1) * N
        out_b = jnp.zeros((N, E), jnp.float32)
        for h in range(H):
            c0, c1 = h * D, (h + 1) * D
            qh = qb[r0:r1, c0:c1]                   # (N, D) bf16
            kh = kb[r0:r1, c0:c1]                   # (N, D) bf16
            vh = vb[r0:r1, c0:c1]                   # (N, D) bf16

            # energy: 'qd,kd->qk' (already scaled via q); f32 accumulate.
            energy = jnp.einsum('qd,kd->qk', qh, kh,
                                preferred_element_type=jnp.float32)  # (N, N)

            # Numerically stable softmax numerator in f32.
            m = jnp.max(energy, axis=-1, keepdims=True)
            e = jnp.exp(energy - m)
            s = jnp.sum(e, axis=-1, keepdims=True)

            # ctx = (e @ v) * 1/s   (denominator folded in after the matmul;
            # EUP reciprocal + (N, D) multiply instead of an (N, N) divide).
            ctx = jnp.dot(e.astype(jnp.bfloat16), vh,
                          preferred_element_type=jnp.float32)        # (N, D)
            ctx = ctx * pl.reciprocal(s, approx=True)

            # Accumulate this head's share of the output projection:
            # concat_h(ctx_h) @ Wp == sum_h ctx_h @ Wp[h*D:(h+1)*D, :]
            out_b = out_b + jnp.dot(ctx.astype(jnp.bfloat16), wp[c0:c1, :],
                                    preferred_element_type=jnp.float32)
        out_b = out_b + bp
        o_ref[b] = out_b.astype(o_ref.dtype)


def _pick_batch_tile(B, N, max_rows=512):
    """Largest batch tile (a divisor of B) that keeps the row slab bounded and,
    when possible, leaves >= 2 grid steps so both v7x TensorCores get work."""
    divs = [d for d in range(1, B + 1) if B % d == 0]
    cand = [d for d in divs if B // d >= 2] or divs
    ok = [d for d in cand if d * N <= max_rows]
    return max(ok) if ok else min(cand)


def _vmem_limit_bytes(bt, N, E):
    """Rough VMEM budget with headroom, clamped under v7x's 64 MiB physical."""
    w = (3 * E * E + E * E) * 2 + (4 * E) * 4            # bf16 weights + f32 biases
    io = 2 * 2 * (bt * N * E) * 4                        # double-buffered x / out blocks
    act = 12 * bt * N * max(E, 128) * 4 + 4 * N * N * 4  # qkv/q/k/v/ctx + energy/e
    est = 2 * (w + io + act)
    return int(min(max(est, 32 * 1024 * 1024), 48 * 1024 * 1024))


def multi_head_attention(x, params, *, num_heads):
    """x: (B, N, E) float32. params: dict of transposed weights/biases (f32)."""
    B, N, E = x.shape
    assert E % num_heads == 0

    # Fuse QKV weights/biases; cast weights to bf16 (halves DMA + VMEM).
    wqkv = jnp.concatenate([params["wq"], params["wk"], params["wv"]],
                           axis=1).astype(jnp.bfloat16)          # (E, 3E)
    bqkv = jnp.concatenate([params["bq"], params["bk"], params["bv"]],
                           axis=1).astype(jnp.float32)           # (1, 3E)
    wp = params["wp"].astype(jnp.bfloat16)                       # (E, E)
    bp = params["bp"].astype(jnp.float32)                        # (1, E)

    bt = _pick_batch_tile(B, N)
    grid = (B // bt,)
    kernel = functools.partial(mha_kernel, num_heads=num_heads, emb_size=E,
                               seq_len=N, batch_tile=bt)
    vmem_limit = _vmem_limit_bytes(bt, N, E)

    def build(single_buffer_weights):
        def wspec(shape):
            idx = lambda b: (0,) * len(shape)
            if single_buffer_weights:
                # Weights are grid-invariant: single-buffer them to halve their
                # VMEM footprint (matters on v7x's 64 MiB).
                return pl.BlockSpec(shape, idx, pipeline_mode=pl.Buffered(1))
            return pl.BlockSpec(shape, idx)

        return pl.pallas_call(
            kernel,
            out_shape=jax.ShapeDtypeStruct((B, N, E), x.dtype),
            grid_spec=pltpu.PrefetchScalarGridSpec(
                num_scalar_prefetch=0,
                grid=grid,
                in_specs=[
                    pl.BlockSpec((bt, N, E), lambda b: (b, 0, 0)),  # x slab
                    wspec((E, 3 * E)),                              # fused Wqkv
                    wspec((1, 3 * E)),                              # fused bqkv
                    wspec((E, E)),                                  # Wp
                    wspec((1, E)),                                  # bp
                ],
                out_specs=pl.BlockSpec((bt, N, E), lambda b: (b, 0, 0)),
            ),
            compiler_params=pltpu.CompilerParams(
                dimension_semantics=("parallel",),
                vmem_limit_bytes=vmem_limit),
        )

    try:
        return build(True)(x, wqkv, bqkv, wp, bp)
    except Exception:
        # pipeline_mode=pl.Buffered(1) not supported on this jax build;
        # fall back to default (double-buffered) weight specs.
        return build(False)(x, wqkv, bqkv, wp, bp)


def reference_mha(x, params, *, num_heads):
    """Pure-JAX f32 reference mirroring the PyTorch forward (mask=None, eval)."""
    B, N, E = x.shape
    D = E // num_heads
    scaling = E ** 0.5

    def lin(x2, w, b):
        return x2 @ w + b  # w already transposed to (in, out)

    q = lin(x, params["wq"], params["bq"]).reshape(B, N, num_heads, D).transpose(0, 2, 1, 3)
    k = lin(x, params["wk"], params["bk"]).reshape(B, N, num_heads, D).transpose(0, 2, 1, 3)
    v = lin(x, params["wv"], params["bv"]).reshape(B, N, num_heads, D).transpose(0, 2, 1, 3)
    energy = jnp.einsum('bhqd,bhkd->bhqk', q, k)
    att = jax.nn.softmax(energy / scaling, axis=-1)
    out = jnp.einsum('bhal,bhlv->bhav', att, v)
    out = out.transpose(0, 2, 1, 3).reshape(B, N, E)
    return lin(out, params["wp"], params["bp"])


def init_params(key, emb_size):
    """Deterministic init mimicking nn.Linear's uniform(-1/sqrt(in), 1/sqrt(in))."""
    keys = jax.random.split(key, 8)
    bound = 1.0 / math.sqrt(emb_size)

    def w(k):  # already transposed: (in, out)
        return jax.random.uniform(k, (emb_size, emb_size), jnp.float32, -bound, bound)

    def b(k):  # kept 2D (1, E) for TPU-friendly layout
        return jax.random.uniform(k, (1, emb_size), jnp.float32, -bound, bound)

    return {
        "wq": w(keys[0]), "bq": b(keys[1]),
        "wk": w(keys[2]), "bk": b(keys[3]),
        "wv": w(keys[4]), "bv": b(keys[5]),
        "wp": w(keys[6]), "bp": b(keys[7]),
    }


if __name__ == "__main__":
    B, N, E, H = 2, 8, 32, 4   # batch, seq, emb_size, num_heads
    key = jax.random.PRNGKey(0)
    kx, kp = jax.random.split(key)

    x = jax.random.normal(kx, (B, N, E), jnp.float32)
    params = init_params(kp, E)

    out = multi_head_attention(x, params, num_heads=H)
    out = jax.block_until_ready(out)

    ref = reference_mha(x, params, num_heads=H)
    assert out.shape == (B, N, E)
    # Tolerance accounts for bf16 matmul operands + approx reciprocal vs f32 reference.
    assert jnp.allclose(out, ref, atol=3e-2, rtol=3e-2), "mismatch vs reference"

    print("KERNEL_OK")
</pallas_src>

<mosaic_0001>
module attributes {stable_mosaic.version = 11 : i64} {
  func.func @mha_kernel(%arg0: i32, %arg1: memref<1x8x32xf32, #tpu.memory_space<vmem>>, %arg2: memref<32x96xbf16, #tpu.memory_space<vmem>>, %arg3: memref<1x96xf32, #tpu.memory_space<vmem>>, %arg4: memref<32x32xbf16, #tpu.memory_space<vmem>>, %arg5: memref<1x32xf32, #tpu.memory_space<vmem>>, %arg6: memref<1x8x32xf32, #tpu.memory_space<vmem>>) attributes {dimension_semantics = [#tpu.dimension_semantics<parallel>], iteration_bounds = array<i64: 2>, scalar_prefetch = 0 : i64, scratch_operands = 0 : i64, tpu.core_type = #tpu.core_type<tc>, window_params = [{transform_indices = @transform_0, window_bounds = array<i64: 1, 8, 32>}, {pipeline_mode = #tpu.pipeline_mode<synchronous>, transform_indices = @transform_1, window_bounds = array<i64: 32, 96>}, {pipeline_mode = #tpu.pipeline_mode<synchronous>, transform_indices = @transform_2, window_bounds = array<i64: 1, 96>}, {pipeline_mode = #tpu.pipeline_mode<synchronous>, transform_indices = @transform_3, window_bounds = array<i64: 32, 32>}, {pipeline_mode = #tpu.pipeline_mode<synchronous>, transform_indices = @transform_4, window_bounds = array<i64: 1, 32>}, {transform_indices = @transform_5, window_bounds = array<i64: 1, 8, 32>}]} {
    %c0 = arith.constant 0 : index
    %c0_0 = arith.constant 0 : index
    %c0_1 = arith.constant 0 : index
    %0 = vector.load %arg1[%c0, %c0_0, %c0_1] : memref<1x8x32xf32, #tpu.memory_space<vmem>>, vector<1x8x32xf32>
    %1 = vector.shape_cast %0 : vector<1x8x32xf32> to vector<8x32xf32>
    %2 = arith.truncf %1 : vector<8x32xf32> to vector<8x32xbf16>
    %c0_2 = arith.constant 0 : index
    %c0_3 = arith.constant 0 : index
    %3 = vector.load %arg2[%c0_2, %c0_3] : memref<32x96xbf16, #tpu.memory_space<vmem>>, vector<32x96xbf16>
    %cst = arith.constant dense<0.000000e+00> : vector<8x96xf32>
    %4 = tpu.matmul %2, %3, %cst {dimension_numbers = #tpu.dot_dimension_numbers<[1], [0], [0], [1], [0, 0, 1, 1], [], []>} : vector<8x32xbf16>, vector<32x96xbf16>, vector<8x96xf32> -> vector<8x96xf32>
    %c0_4 = arith.constant 0 : index
    %c0_5 = arith.constant 0 : index
    %5 = vector.load %arg3[%c0_4, %c0_5] : memref<1x96xf32, #tpu.memory_space<vmem>>, vector<1x96xf32>
    %6 = vector.broadcast %5 : vector<1x96xf32> to vector<8x96xf32>
    %7 = arith.addf %4, %6 : vector<8x96xf32>
    %8 = vector.extract_strided_slice %7 {offsets = [0, 0], sizes = [8, 32], strides = [1, 1]} : vector<8x96xf32> to vector<8x32xf32>
    %cst_6 = arith.constant 0.176776692 : f32
    %9 = vector.broadcast %cst_6 : f32 to vector<8x32xf32>
    %10 = arith.mulf %8, %9 : vector<8x32xf32>
    %11 = vector.extract_strided_slice %7 {offsets = [0, 32], sizes = [8, 32], strides = [1, 1]} : vector<8x96xf32> to vector<8x32xf32>
    %12 = vector.extract_strided_slice %7 {offsets = [0, 64], sizes = [8, 32], strides = [1, 1]} : vector<8x96xf32> to vector<8x32xf32>
    %13 = arith.truncf %10 : vector<8x32xf32> to vector<8x32xbf16>
    %14 = arith.truncf %11 : vector<8x32xf32> to vector<8x32xbf16>
    %15 = arith.truncf %12 : vector<8x32xf32> to vector<8x32xbf16>
    %c0_7 = arith.constant 0 : index
    %c0_8 = arith.constant 0 : index
    %16 = vector.load %arg4[%c0_7, %c0_8] : memref<32x32xbf16, #tpu.memory_space<vmem>>, vector<32x32xbf16>
    %c0_9 = arith.constant 0 : index
    %c0_10 = arith.constant 0 : index
    %17 = vector.load %arg5[%c0_9, %c0_10] : memref<1x32xf32, #tpu.memory_space<vmem>>, vector<1x32xf32>
    %cst_11 = arith.constant 0.000000e+00 : f32
    %18 = vector.broadcast %cst_11 : f32 to vector<8x32xf32>
    %19 = vector.extract_strided_slice %13 {offsets = [0, 0], sizes = [8, 8], strides = [1, 1]} : vector<8x32xbf16> to vector<8x8xbf16>
    %20 = vector.extract_strided_slice %14 {offsets = [0, 0], sizes = [8, 8], strides = [1, 1]} : vector<8x32xbf16> to vector<8x8xbf16>
    %21 = vector.extract_strided_slice %15 {offsets = [0, 0], sizes = [8, 8], strides = [1, 1]} : vector<8x32xbf16> to vector<8x8xbf16>
    "tpu.trace_start"() <{level = 10 : i32, message = "qd,kd->qk"}> : () -> ()
    %cst_12 = arith.constant dense<0.000000e+00> : vector<8x8xf32>
    %22 = tpu.matmul %19, %20, %cst_12 {dimension_numbers = #tpu.dot_dimension_numbers<[1], [1], [0], [0], [0, 0, 1, 0], [], []>} : vector<8x8xbf16>, vector<8x8xbf16>, vector<8x8xf32> -> vector<8x8xf32>
    "tpu.trace_stop"() : () -> ()
    %cst_13 = arith.constant dense<0xFF800000> : vector<8xf32>
    %23 = vector.multi_reduction <maximumf>, %22, %cst_13 [1] : vector<8x8xf32> to vector<8xf32>
    %24 = vector.shape_cast %23 : vector<8xf32> to vector<8x1xf32>
    %25 = vector.broadcast %24 : vector<8x1xf32> to vector<8x8xf32>
    %26 = arith.subf %22, %25 : vector<8x8xf32>
    %27 = math.exp %26 : vector<8x8xf32>
    %cst_14 = arith.constant dense<0.000000e+00> : vector<8xf32>
    %28 = vector.multi_reduction <add>, %27, %cst_14 [1] : vector<8x8xf32> to vector<8xf32>
    %29 = vector.shape_cast %28 : vector<8xf32> to vector<8x1xf32>
    %30 = arith.truncf %27 : vector<8x8xf32> to vector<8x8xbf16>
    %cst_15 = arith.constant dense<0.000000e+00> : vector<8x8xf32>
    %31 = tpu.matmul %30, %21, %cst_15 {dimension_numbers = #tpu.dot_dimension_numbers<[1], [0], [0], [1], [0, 0, 1, 1], [], []>} : vector<8x8xbf16>, vector<8x8xbf16>, vector<8x8xf32> -> vector<8x8xf32>
    %32 = tpu.reciprocal %29 {approx = true} : vector<8x1xf32> -> vector<8x1xf32>
    %33 = vector.broadcast %32 : vector<8x1xf32> to vector<8x8xf32>
    %34 = arith.mulf %31, %33 : vector<8x8xf32>
    %35 = arith.truncf %34 : vector<8x8xf32> to vector<8x8xbf16>
    %36 = vector.extract_strided_slice %16 {offsets = [0, 0], sizes = [8, 32], strides = [1, 1]} : vector<32x32xbf16> to vector<8x32xbf16>
    %cst_16 = arith.constant dense<0.000000e+00> : vector<8x32xf32>
    %37 = tpu.matmul %35, %36, %cst_16 {dimension_numbers = #tpu.dot_dimension_numbers<[1], [0], [0], [1], [0, 0, 1, 1], [], []>} : vector<8x8xbf16>, vector<8x32xbf16>, vector<8x32xf32> -> vector<8x32xf32>
    %38 = arith.addf %18, %37 : vector<8x32xf32>
    %39 = vector.extract_strided_slice %13 {offsets = [0, 8], sizes = [8, 8], strides = [1, 1]} : vector<8x32xbf16> to vector<8x8xbf16>
    %40 = vector.extract_strided_slice %14 {offsets = [0, 8], sizes = [8, 8], strides = [1, 1]} : vector<8x32xbf16> to vector<8x8xbf16>
    %41 = vector.extract_strided_slice %15 {offsets = [0, 8], sizes = [8, 8], strides = [1, 1]} : vector<8x32xbf16> to vector<8x8xbf16>
    "tpu.trace_start"() <{level = 10 : i32, message = "qd,kd->qk"}> : () -> ()
    %cst_17 = arith.constant dense<0.000000e+00> : vector<8x8xf32>
    %42 = tpu.matmul %39, %40, %cst_17 {dimension_numbers = #tpu.dot_dimension_numbers<[1], [1], [0], [0], [0, 0, 1, 0], [], []>} : vector<8x8xbf16>, vector<8x8xbf16>, vector<8x8xf32> -> vector<8x8xf32>
    "tpu.trace_stop"() : () -> ()
    %cst_18 = arith.constant dense<0xFF800000> : vector<8xf32>
    %43 = vector.multi_reduction <maximumf>, %42, %cst_18 [1] : vector<8x8xf32> to vector<8xf32>
    %44 = vector.shape_cast %43 : vector<8xf32> to vector<8x1xf32>
    %45 = vector.broadcast %44 : vector<8x1xf32> to vector<8x8xf32>
    %46 = arith.subf %42, %45 : vector<8x8xf32>
    %47 = math.exp %46 : vector<8x8xf32>
    %cst_19 = arith.constant dense<0.000000e+00> : vector<8xf32>
    %48 = vector.multi_reduction <add>, %47, %cst_19 [1] : vector<8x8xf32> to vector<8xf32>
    %49 = vector.shape_cast %48 : vector<8xf32> to vector<8x1xf32>
    %50 = arith.truncf %47 : vector<8x8xf32> to vector<8x8xbf16>
    %cst_20 = arith.constant dense<0.000000e+00> : vector<8x8xf32>
    %51 = tpu.matmul %50, %41, %cst_20 {dimension_numbers = #tpu.dot_dimension_numbers<[1], [0], [0], [1], [0, 0, 1, 1], [], []>} : vector<8x8xbf16>, vector<8x8xbf16>, vector<8x8xf32> -> vector<8x8xf32>
    %52 = tpu.reciprocal %49 {approx = true} : vector<8x1xf32> -> vector<8x1xf32>
    %53 = vector.broadcast %52 : vector<8x1xf32> to vector<8x8xf32>
    %54 = arith.mulf %51, %53 : vector<8x8xf32>
    %55 = arith.truncf %54 : vector<8x8xf32> to vector<8x8xbf16>
    %56 = vector.extract_strided_slice %16 {offsets = [8, 0], sizes = [8, 32], strides = [1, 1]} : vector<32x32xbf16> to vector<8x32xbf16>
    %cst_21 = arith.constant dense<0.000000e+00> : vector<8x32xf32>
    %57 = tpu.matmul %55, %56, %cst_21 {dimension_numbers = #tpu.dot_dimension_numbers<[1], [0], [0], [1], [0, 0, 1, 1], [], []>} : vector<8x8xbf16>, vector<8x32xbf16>, vector<8x32xf32> -> vector<8x32xf32>
    %58 = arith.addf %38, %57 : vector<8x32xf32>
    %59 = vector.extract_strided_slice %13 {offsets = [0, 16], sizes = [8, 8], strides = [1, 1]} : vector<8x32xbf16> to vector<8x8xbf16>
    %60 = vector.extract_strided_slice %14 {offsets = [0, 16], sizes = [8, 8], strides = [1, 1]} : vector<8x32xbf16> to vector<8x8xbf16>
    %61 = vector.extract_strided_slice %15 {offsets = [0, 16], sizes = [8, 8], strides = [1, 1]} : vector<8x32xbf16> to vector<8x8xbf16>
    "tpu.trace_start"() <{level = 10 : i32, message = "qd,kd->qk"}> : () -> ()
    %cst_22 = arith.constant dense<0.000000e+00> : vector<8x8xf32>
    %62 = tpu.matmul %59, %60, %cst_22 {dimension_numbers = #tpu.dot_dimension_numbers<[1], [1], [0], [0], [0, 0, 1, 0], [], []>} : vector<8x8xbf16>, vector<8x8xbf16>, vector<8x8xf32> -> vector<8x8xf32>
    "tpu.trace_stop"() : () -> ()
    %cst_23 = arith.constant dense<0xFF800000> : vector<8xf32>
    %63 = vector.multi_reduction <maximumf>, %62, %cst_23 [1] : vector<8x8xf32> to vector<8xf32>
    %64 = vector.shape_cast %63 : vector<8xf32> to vector<8x1xf32>
    %65 = vector.broadcast %64 : vector<8x1xf32> to vector<8x8xf32>
    %66 = arith.subf %62, %65 : vector<8x8xf32>
    %67 = math.exp %66 : vector<8x8xf32>
    %cst_24 = arith.constant dense<0.000000e+00> : vector<8xf32>
    %68 = vector.multi_reduction <add>, %67, %cst_24 [1] : vector<8x8xf32> to vector<8xf32>
    %69 = vector.shape_cast %68 : vector<8xf32> to vector<8x1xf32>
    %70 = arith.truncf %67 : vector<8x8xf32> to vector<8x8xbf16>
    %cst_25 = arith.constant dense<0.000000e+00> : vector<8x8xf32>
    %71 = tpu.matmul %70, %61, %cst_25 {dimension_numbers = #tpu.dot_dimension_numbers<[1], [0], [0], [1], [0, 0, 1, 1], [], []>} : vector<8x8xbf16>, vector<8x8xbf16>, vector<8x8xf32> -> vector<8x8xf32>
    %72 = tpu.reciprocal %69 {approx = true} : vector<8x1xf32> -> vector<8x1xf32>
    %73 = vector.broadcast %72 : vector<8x1xf32> to vector<8x8xf32>
    %74 = arith.mulf %71, %73 : vector<8x8xf32>
    %75 = arith.truncf %74 : vector<8x8xf32> to vector<8x8xbf16>
    %76 = vector.extract_strided_slice %16 {offsets = [16, 0], sizes = [8, 32], strides = [1, 1]} : vector<32x32xbf16> to vector<8x32xbf16>
    %cst_26 = arith.constant dense<0.000000e+00> : vector<8x32xf32>
    %77 = tpu.matmul %75, %76, %cst_26 {dimension_numbers = #tpu.dot_dimension_numbers<[1], [0], [0], [1], [0, 0, 1, 1], [], []>} : vector<8x8xbf16>, vector<8x32xbf16>, vector<8x32xf32> -> vector<8x32xf32>
    %78 = arith.addf %58, %77 : vector<8x32xf32>
    %79 = vector.extract_strided_slice %13 {offsets = [0, 24], sizes = [8, 8], strides = [1, 1]} : vector<8x32xbf16> to vector<8x8xbf16>
    %80 = vector.extract_strided_slice %14 {offsets = [0, 24], sizes = [8, 8], strides = [1, 1]} : vector<8x32xbf16> to vector<8x8xbf16>
    %81 = vector.extract_strided_slice %15 {offsets = [0, 24], sizes = [8, 8], strides = [1, 1]} : vector<8x32xbf16> to vector<8x8xbf16>
    "tpu.trace_start"() <{level = 10 : i32, message = "qd,kd->qk"}> : () -> ()
    %cst_27 = arith.constant dense<0.000000e+00> : vector<8x8xf32>
    %82 = tpu.matmul %79, %80, %cst_27 {dimension_numbers = #tpu.dot_dimension_numbers<[1], [1], [0], [0], [0, 0, 1, 0], [], []>} : vector<8x8xbf16>, vector<8x8xbf16>, vector<8x8xf32> -> vector<8x8xf32>
    "tpu.trace_stop"() : () -> ()
    %cst_28 = arith.constant dense<0xFF800000> : vector<8xf32>
    %83 = vector.multi_reduction <maximumf>, %82, %cst_28 [1] : vector<8x8xf32> to vector<8xf32>
    %84 = vector.shape_cast %83 : vector<8xf32> to vector<8x1xf32>
    %85 = vector.broadcast %84 : vector<8x1xf32> to vector<8x8xf32>
    %86 = arith.subf %82, %85 : vector<8x8xf32>
    %87 = math.exp %86 : vector<8x8xf32>
    %cst_29 = arith.constant dense<0.000000e+00> : vector<8xf32>
    %88 = vector.multi_reduction <add>, %87, %cst_29 [1] : vector<8x8xf32> to vector<8xf32>
    %89 = vector.shape_cast %88 : vector<8xf32> to vector<8x1xf32>
    %90 = arith.truncf %87 : vector<8x8xf32> to vector<8x8xbf16>
    %cst_30 = arith.constant dense<0.000000e+00> : vector<8x8xf32>
    %91 = tpu.matmul %90, %81, %cst_30 {dimension_numbers = #tpu.dot_dimension_numbers<[1], [0], [0], [1], [0, 0, 1, 1], [], []>} : vector<8x8xbf16>, vector<8x8xbf16>, vector<8x8xf32> -> vector<8x8xf32>
    %92 = tpu.reciprocal %89 {approx = true} : vector<8x1xf32> -> vector<8x1xf32>
    %93 = vector.broadcast %92 : vector<8x1xf32> to vector<8x8xf32>
    %94 = arith.mulf %91, %93 : vector<8x8xf32>
    %95 = arith.truncf %94 : vector<8x8xf32> to vector<8x8xbf16>
    %96 = vector.extract_strided_slice %16 {offsets = [24, 0], sizes = [8, 32], strides = [1, 1]} : vector<32x32xbf16> to vector<8x32xbf16>
    %cst_31 = arith.constant dense<0.000000e+00> : vector<8x32xf32>
    %97 = tpu.matmul %95, %96, %cst_31 {dimension_numbers = #tpu.dot_dimension_numbers<[1], [0], [0], [1], [0, 0, 1, 1], [], []>} : vector<8x8xbf16>, vector<8x32xbf16>, vector<8x32xf32> -> vector<8x32xf32>
    %98 = arith.addf %78, %97 : vector<8x32xf32>
    %99 = vector.broadcast %17 : vector<1x32xf32> to vector<8x32xf32>
    %100 = arith.addf %98, %99 : vector<8x32xf32>
    %c0_32 = arith.constant 0 : index
    %c0_33 = arith.constant 0 : index
    %c0_34 = arith.constant 0 : index
    %101 = vector.load %arg6[%c0_32, %c0_33, %c0_34] : memref<1x8x32xf32, #tpu.memory_space<vmem>>, vector<1x8x32xf32>
    %102 = vector.shape_cast %101 : vector<1x8x32xf32> to vector<8x32xf32>
    %103 = vector.shape_cast %100 : vector<8x32xf32> to vector<1x8x32xf32>
    tpu.vector_store %arg6[%c0_32, %c0_33, %c0_34], %103 {strides = array<i32>} : memref<1x8x32xf32, #tpu.memory_space<vmem>>, vector<1x8x32xf32>,
    return
  }
  func.func @transform_0(%arg0: i32) -> (i32, i32, i32) {
    %c0_i32 = arith.constant 0 : i32
    %c0_i32_0 = arith.constant 0 : i32
    %c0_i32_1 = arith.constant 0 : i32
    return %arg0, %c0_i32, %c0_i32_0 : i32, i32, i32
  }
  func.func @transform_1(%arg0: i32) -> (i32, i32) {
    %c0_i32 = arith.constant 0 : i32
    %c0_i32_0 = arith.constant 0 : i32
    %c0_i32_1 = arith.constant 0 : i32
    return %c0_i32, %c0_i32_0 : i32, i32
  }
  func.func @transform_2(%arg0: i32) -> (i32, i32) {
    %c0_i32 = arith.constant 0 : i32
    %c0_i32_0 = arith.constant 0 : i32
    %c0_i32_1 = arith.constant 0 : i32
    return %c0_i32, %c0_i32_0 : i32, i32
  }
  func.func @transform_3(%arg0: i32) -> (i32, i32) {
    %c0_i32 = arith.constant 0 : i32
    %c0_i32_0 = arith.constant 0 : i32
    %c0_i32_1 = arith.constant 0 : i32
    return %c0_i32, %c0_i32_0 : i32, i32
  }
  func.func @transform_4(%arg0: i32) -> (i32, i32) {
    %c0_i32 = arith.constant 0 : i32
    %c0_i32_0 = arith.constant 0 : i32
    %c0_i32_1 = arith.constant 0 : i32
    return %c0_i32, %c0_i32_0 : i32, i32
  }
  func.func @transform_5(%arg0: i32) -> (i32, i32, i32) {
    %c0_i32 = arith.constant 0 : i32
    %c0_i32_0 = arith.constant 0 : i32
    %c0_i32_1 = arith.constant 0 : i32
    return %arg0, %c0_i32, %c0_i32_0 : i32, i32, i32
  }
}

module attributes {stable_mosaic.version = 11 : i64} {
  func.func @mha_kernel(%arg0: i32, %arg1: memref<1x8x32xf32, #tpu.memory_space<vmem>>, %arg2: memref<32x96xbf16, #tpu.memory_space<vmem>>, %arg3: memref<1x96xf32, #tpu.memory_space<vmem>>, %arg4: memref<32x32xbf16, #tpu.memory_space<vmem>>, %arg5: memref<1x32xf32, #tpu.memory_space<vmem>>, %arg6: memref<1x8x32xf32, #tpu.memory_space<vmem>>) attributes {dimension_semantics = [#tpu.dimension_semantics<parallel>], iteration_bounds = array<i64: 2>, scalar_prefetch = 0 : i64, scratch_operands = 0 : i64, tpu.core_type = #tpu.core_type<tc>, window_params = [{transform_indices = @transform_0, window_bounds = array<i64: 1, 8, 32>}, {pipeline_mode = #tpu.pipeline_mode<synchronous>, transform_indices = @transform_1, window_bounds = array<i64: 32, 96>}, {pipeline_mode = #tpu.pipeline_mode<synchronous>, transform_indices = @transform_2, window_bounds = array<i64: 1, 96>}, {pipeline_mode = #tpu.pipeline_mode<synchronous>, transform_indices = @transform_3, window_bounds = array<i64: 32, 32>}, {pipeline_mode = #tpu.pipeline_mode<synchronous>, transform_indices = @transform_4, window_bounds = array<i64: 1, 32>}, {transform_indices = @transform_5, window_bounds = array<i64: 1, 8, 32>}]} {
    %c0 = arith.constant 0 : index
    %c0_0 = arith.constant 0 : index
    %c0_1 = arith.constant 0 : index
    %0 = vector.load %arg1[%c0, %c0_0, %c0_1] : memref<1x8x32xf32, #tpu.memory_space<vmem>>, vector<1x8x32xf32>
    %1 = vector.shape_cast %0 : vector<1x8x32xf32> to vector<8x32xf32>
    %2 = arith.truncf %1 : vector<8x32xf32> to vector<8x32xbf16>
    %c0_2 = arith.constant 0 : index
    %c0_3 = arith.constant 0 : index
    %3 = vector.load %arg2[%c0_2, %c0_3] : memref<32x96xbf16, #tpu.memory_space<vmem>>, vector<32x96xbf16>
    %cst = arith.constant dense<0.000000e+00> : vector<8x96xf32>
    %4 = tpu.matmul %2, %3, %cst {dimension_numbers = #tpu.dot_dimension_numbers<[1], [0], [0], [1], [0, 0, 1, 1], [], []>} : vector<8x32xbf16>, vector<32x96xbf16>, vector<8x96xf32> -> vector<8x96xf32>
    %c0_4 = arith.constant 0 : index
    %c0_5 = arith.constant 0 : index
    %5 = vector.load %arg3[%c0_4, %c0_5] : memref<1x96xf32, #tpu.memory_space<vmem>>, vector<1x96xf32>
    %6 = vector.broadcast %5 : vector<1x96xf32> to vector<8x96xf32>
    %7 = arith.addf %4, %6 : vector<8x96xf32>
    %8 = vector.extract_strided_slice %7 {offsets = [0, 0], sizes = [8, 32], strides = [1, 1]} : vector<8x96xf32> to vector<8x32xf32>
    %cst_6 = arith.constant 0.176776692 : f32
    %9 = vector.broadcast %cst_6 : f32 to vector<8x32xf32>
    %10 = arith.mulf %8, %9 : vector<8x32xf32>
    %11 = vector.extract_strided_slice %7 {offsets = [0, 32], sizes = [8, 32], strides = [1, 1]} : vector<8x96xf32> to vector<8x32xf32>
    %12 = vector.extract_strided_slice %7 {offsets = [0, 64], sizes = [8, 32], strides = [1, 1]} : vector<8x96xf32> to vector<8x32xf32>
    %13 = arith.truncf %10 : vector<8x32xf32> to vector<8x32xbf16>
    %14 = arith.truncf %11 : vector<8x32xf32> to vector<8x32xbf16>
    %15 = arith.truncf %12 : vector<8x32xf32> to vector<8x32xbf16>
    %c0_7 = arith.constant 0 : index
    %c0_8 = arith.constant 0 : index
    %16 = vector.load %arg4[%c0_7, %c0_8] : memref<32x32xbf16, #tpu.memory_space<vmem>>, vector<32x32xbf16>
    %c0_9 = arith.constant 0 : index
    %c0_10 = arith.constant 0 : index
    %17 = vector.load %arg5[%c0_9, %c0_10] : memref<1x32xf32, #tpu.memory_space<vmem>>, vector<1x32xf32>
    %cst_11 = arith.constant 0.000000e+00 : f32
    %18 = vector.broadcast %cst_11 : f32 to vector<8x32xf32>
    %19 = vector.extract_strided_slice %13 {offsets = [0, 0], sizes = [8, 8], strides = [1, 1]} : vector<8x32xbf16> to vector<8x8xbf16>
    %20 = vector.extract_strided_slice %14 {offsets = [0, 0], sizes = [8, 8], strides = [1, 1]} : vector<8x32xbf16> to vector<8x8xbf16>
    %21 = vector.extract_strided_slice %15 {offsets = [0, 0], sizes = [8, 8], strides = [1, 1]} : vector<8x32xbf16> to vector<8x8xbf16>
    "tpu.trace_start"() <{level = 10 : i32, message = "qd,kd->qk"}> : () -> ()
    %cst_12 = arith.constant dense<0.000000e+00> : vector<8x8xf32>
    %22 = tpu.matmul %19, %20, %cst_12 {dimension_numbers = #tpu.dot_dimension_numbers<[1], [1], [0], [0], [0, 0, 1, 0], [], []>} : vector<8x8xbf16>, vector<8x8xbf16>, vector<8x8xf32> -> vector<8x8xf32>
    "tpu.trace_stop"() : () -> ()
    %cst_13 = arith.constant dense<0xFF800000> : vector<8xf32>
    %23 = vector.multi_reduction <maximumf>, %22, %cst_13 [1] : vector<8x8xf32> to vector<8xf32>
    %24 = vector.shape_cast %23 : vector<8xf32> to vector<8x1xf32>
    %25 = vector.broadcast %24 : vector<8x1xf32> to vector<8x8xf32>
    %26 = arith.subf %22, %25 : vector<8x8xf32>
    %27 = math.exp %26 : vector<8x8xf32>
    %cst_14 = arith.constant dense<0.000000e+00> : vector<8xf32>
    %28 = vector.multi_reduction <add>, %27, %cst_14 [1] : vector<8x8xf32> to vector<8xf32>
    %29 = vector.shape_cast %28 : vector<8xf32> to vector<8x1xf32>
    %30 = arith.truncf %27 : vector<8x8xf32> to vector<8x8xbf16>
    %cst_15 = arith.constant dense<0.000000e+00> : vector<8x8xf32>
    %31 = tpu.matmul %30, %21, %cst_15 {dimension_numbers = #tpu.dot_dimension_numbers<[1], [0], [0], [1], [0, 0, 1, 1], [], []>} : vector<8x8xbf16>, vector<8x8xbf16>, vector<8x8xf32> -> vector<8x8xf32>
    %32 = tpu.reciprocal %29 {approx = true} : vector<8x1xf32> -> vector<8x1xf32>
    %33 = vector.broadcast %32 : vector<8x1xf32> to vector<8x8xf32>
    %34 = arith.mulf %31, %33 : vector<8x8xf32>
    %35 = arith.truncf %34 : vector<8x8xf32> to vector<8x8xbf16>
    %36 = vector.extract_strided_slice %16 {offsets = [0, 0], sizes = [8, 32], strides = [1, 1]} : vector<32x32xbf16> to vector<8x32xbf16>
    %cst_16 = arith.constant dense<0.000000e+00> : vector<8x32xf32>
    %37 = tpu.matmul %35, %36, %cst_16 {dimension_numbers = #tpu.dot_dimension_numbers<[1], [0], [0], [1], [0, 0, 1, 1], [], []>} : vector<8x8xbf16>, vector<8x32xbf16>, vector<8x32xf32> -> vector<8x32xf32>
    %38 = arith.addf %18, %37 : vector<8x32xf32>
    %39 = vector.extract_strided_slice %13 {offsets = [0, 8], sizes = [8, 8], strides = [1, 1]} : vector<8x32xbf16> to vector<8x8xbf16>
    %40 = vector.extract_strided_slice %14 {offsets = [0, 8], sizes = [8, 8], strides = [1, 1]} : vector<8x32xbf16> to vector<8x8xbf16>
    %41 = vector.extract_strided_slice %15 {offsets = [0, 8], sizes = [8, 8], strides = [1, 1]} : vector<8x32xbf16> to vector<8x8xbf16>
    "tpu.trace_start"() <{level = 10 : i32, message = "qd,kd->qk"}> : () -> ()
    %cst_17 = arith.constant dense<0.000000e+00> : vector<8x8xf32>
    %42 = tpu.matmul %39, %40, %cst_17 {dimension_numbers = #tpu.dot_dimension_numbers<[1], [1], [0], [0], [0, 0, 1, 0], [], []>} : vector<8x8xbf16>, vector<8x8xbf16>, vector<8x8xf32> -> vector<8x8xf32>
    "tpu.trace_stop"() : () -> ()
    %cst_18 = arith.constant dense<0xFF800000> : vector<8xf32>
    %43 = vector.multi_reduction <maximumf>, %42, %cst_18 [1] : vector<8x8xf32> to vector<8xf32>
    %44 = vector.shape_cast %43 : vector<8xf32> to vector<8x1xf32>
    %45 = vector.broadcast %44 : vector<8x1xf32> to vector<8x8xf32>
    %46 = arith.subf %42, %45 : vector<8x8xf32>
    %47 = math.exp %46 : vector<8x8xf32>
    %cst_19 = arith.constant dense<0.000000e+00> : vector<8xf32>
    %48 = vector.multi_reduction <add>, %47, %cst_19 [1] : vector<8x8xf32> to vector<8xf32>
    %49 = vector.shape_cast %48 : vector<8xf32> to vector<8x1xf32>
    %50 = arith.truncf %47 : vector<8x8xf32> to vector<8x8xbf16>
    %cst_20 = arith.constant dense<0.000000e+00> : vector<8x8xf32>
    %51 = tpu.matmul %50, %41, %cst_20 {dimension_numbers = #tpu.dot_dimension_numbers<[1], [0], [0], [1], [0, 0, 1, 1], [], []>} : vector<8x8xbf16>, vector<8x8xbf16>, vector<8x8xf32> -> vector<8x8xf32>
    %52 = tpu.reciprocal %49 {approx = true} : vector<8x1xf32> -> vector<8x1xf32>
    %53 = vector.broadcast %52 : vector<8x1xf32> to vector<8x8xf32>
    %54 = arith.mulf %51, %53 : vector<8x8xf32>
    %55 = arith.truncf %54 : vector<8x8xf32> to vector<8x8xbf16>
    %56 = vector.extract_strided_slice %16 {offsets = [8, 0], sizes = [8, 32], strides = [1, 1]} : vector<32x32xbf16> to vector<8x32xbf16>
    %cst_21 = arith.constant dense<0.000000e+00> : vector<8x32xf32>
    %57 = tpu.matmul %55, %56, %cst_21 {dimension_numbers = #tpu.dot_dimension_numbers<[1], [0], [0], [1], [0, 0, 1, 1], [], []>} : vector<8x8xbf16>, vector<8x32xbf16>, vector<8x32xf32> -> vector<8x32xf32>
    %58 = arith.addf %38, %57 : vector<8x32xf32>
    %59 = vector.extract_strided_slice %13 {offsets = [0, 16], sizes = [8, 8], strides = [1, 1]} : vector<8x32xbf16> to vector<8x8xbf16>
    %60 = vector.extract_strided_slice %14 {offsets = [0, 16], sizes = [8, 8], strides = [1, 1]} : vector<8x32xbf16> to vector<8x8xbf16>
    %61 = vector.extract_strided_slice %15 {offsets = [0, 16], sizes = [8, 8], strides = [1, 1]} : vector<8x32xbf16> to vector<8x8xbf16>
    "tpu.trace_start"() <{level = 10 : i32, message = "qd,kd->qk"}> : () -> ()
    %cst_22 = arith.constant dense<0.000000e+00> : vector<8x8xf32>
    %62 = tpu.matmul %59, %60, %cst_22 {dimension_numbers = #tpu.dot_dimension_numbers<[1], [1], [0], [0], [0, 0, 1, 0], [], []>} : vector<8x8xbf16>, vector<8x8xbf16>, vector<8x8xf32> -> vector<8x8xf32>
    "tpu.trace_stop"() : () -> ()
    %cst_23 = arith.constant dense<0xFF800000> : vector<8xf32>
    %63 = vector.multi_reduction <maximumf>, %62, %cst_23 [1] : vector<8x8xf32> to vector<8xf32>
    %64 = vector.shape_cast %63 : vector<8xf32> to vector<8x1xf32>
    %65 = vector.broadcast %64 : vector<8x1xf32> to vector<8x8xf32>
    %66 = arith.subf %62, %65 : vector<8x8xf32>
    %67 = math.exp %66 : vector<8x8xf32>
    %cst_24 = arith.constant dense<0.000000e+00> : vector<8xf32>
    %68 = vector.multi_reduction <add>, %67, %cst_24 [1] : vector<8x8xf32> to vector<8xf32>
    %69 = vector.shape_cast %68 : vector<8xf32> to vector<8x1xf32>
    %70 = arith.truncf %67 : vector<8x8xf32> to vector<8x8xbf16>
    %cst_25 = arith.constant dense<0.000000e+00> : vector<8x8xf32>
    %71 = tpu.matmul %70, %61, %cst_25 {dimension_numbers = #tpu.dot_dimension_numbers<[1], [0], [0], [1], [0, 0, 1, 1], [], []>} : vector<8x8xbf16>, vector<8x8xbf16>, vector<8x8xf32> -> vector<8x8xf32>
    %72 = tpu.reciprocal %69 {approx = true} : vector<8x1xf32> -> vector<8x1xf32>
    %73 = vector.broadcast %72 : vector<8x1xf32> to vector<8x8xf32>
    %74 = arith.mulf %71, %73 : vector<8x8xf32>
    %75 = arith.truncf %74 : vector<8x8xf32> to vector<8x8xbf16>
    %76 = vector.extract_strided_slice %16 {offsets = [16, 0], sizes = [8, 32], strides = [1, 1]} : vector<32x32xbf16> to vector<8x32xbf16>
    %cst_26 = arith.constant dense<0.000000e+00> : vector<8x32xf32>
    %77 = tpu.matmul %75, %76, %cst_26 {dimension_numbers = #tpu.dot_dimension_numbers<[1], [0], [0], [1], [0, 0, 1, 1], [], []>} : vector<8x8xbf16>, vector<8x32xbf16>, vector<8x32xf32> -> vector<8x32xf32>
    %78 = arith.addf %58, %77 : vector<8x32xf32>
    %79 = vector.extract_strided_slice %13 {offsets = [0, 24], sizes = [8, 8], strides = [1, 1]} : vector<8x32xbf16> to vector<8x8xbf16>
    %80 = vector.extract_strided_slice %14 {offsets = [0, 24], sizes = [8, 8], strides = [1, 1]} : vector<8x32xbf16> to vector<8x8xbf16>
    %81 = vector.extract_strided_slice %15 {offsets = [0, 24], sizes = [8, 8], strides = [1, 1]} : vector<8x32xbf16> to vector<8x8xbf16>
    "tpu.trace_start"() <{level = 10 : i32, message = "qd,kd->qk"}> : () -> ()
    %cst_27 = arith.constant dense<0.000000e+00> : vector<8x8xf32>
    %82 = tpu.matmul %79, %80, %cst_27 {dimension_numbers = #tpu.dot_dimension_numbers<[1], [1], [0], [0], [0, 0, 1, 0], [], []>} : vector<8x8xbf16>, vector<8x8xbf16>, vector<8x8xf32> -> vector<8x8xf32>
    "tpu.trace_stop"() : () -> ()
    %cst_28 = arith.constant dense<0xFF800000> : vector<8xf32>
    %83 = vector.multi_reduction <maximumf>, %82, %cst_28 [1] : vector<8x8xf32> to vector<8xf32>
    %84 = vector.shape_cast %83 : vector<8xf32> to vector<8x1xf32>
    %85 = vector.broadcast %84 : vector<8x1xf32> to vector<8x8xf32>
    %86 = arith.subf %82, %85 : vector<8x8xf32>
    %87 = math.exp %86 : vector<8x8xf32>
    %cst_29 = arith.constant dense<0.000000e+00> : vector<8xf32>
    %88 = vector.multi_reduction <add>, %87, %cst_29 [1] : vector<8x8xf32> to vector<8xf32>
    %89 = vector.shape_cast %88 : vector<8xf32> to vector<8x1xf32>
    %90 = arith.truncf %87 : vector<8x8xf32> to vector<8x8xbf16>
    %cst_30 = arith.constant dense<0.000000e+00> : vector<8x8xf32>
    %91 = tpu.matmul %90, %81, %cst_30 {dimension_numbers = #tpu.dot_dimension_numbers<[1], [0], [0], [1], [0, 0, 1, 1], [], []>} : vector<8x8xbf16>, vector<8x8xbf16>, vector<8x8xf32> -> vector<8x8xf32>
    %92 = tpu.reciprocal %89 {approx = true} : vector<8x1xf32> -> vector<8x1xf32>
    %93 = vector.broadcast %92 : vector<8x1xf32> to vector<8x8xf32>
    %94 = arith.mulf %91, %93 : vector<8x8xf32>
    %95 = arith.truncf %94 : vector<8x8xf32> to vector<8x8xbf16>
    %96 = vector.extract_strided_slice %16 {offsets = [24, 0], sizes = [8, 32], strides = [1, 1]} : vector<32x32xbf16> to vector<8x32xbf16>
    %cst_31 = arith.constant dense<0.000000e+00> : vector<8x32xf32>
    %97 = tpu.matmul %95, %96, %cst_31 {dimension_numbers = #tpu.dot_dimension_numbers<[1], [0], [0], [1], [0, 0, 1, 1], [], []>} : vector<8x8xbf16>, vector<8x32xbf16>, vector<8x32xf32> -> vector<8x32xf32>
    %98 = arith.addf %78, %97 : vector<8x32xf32>
    %99 = vector.broadcast %17 : vector<1x32xf32> to vector<8x32xf32>
    %100 = arith.addf %98, %99 : vector<8x32xf32>
    %c0_32 = arith.constant 0 : index
    %c0_33 = arith.constant 0 : index
    %c0_34 = arith.constant 0 : index
    %101 = vector.load %arg6[%c0_32, %c0_33, %c0_34] : memref<1x8x32xf32, #tpu.memory_space<vmem>>, vector<1x8x32xf32>
    %102 = vector.shape_cast %101 : vector<1x8x32xf32> to vector<8x32xf32>
    %103 = vector.shape_cast %100 : vector<8x32xf32> to vector<1x8x32xf32>
    tpu.vector_store %arg6[%c0_32, %c0_33, %c0_34], %103 {strides = array<i32>} : memref<1x8x32xf32, #tpu.memory_space<vmem>>, vector<1x8x32xf32>,
    return
  }
  func.func @transform_0(%arg0: i32) -> (i32, i32, i32) {
    %c0_i32 = arith.constant 0 : i32
    %c0_i32_0 = arith.constant 0 : i32
    %c0_i32_1 = arith.constant 0 : i32
    return %arg0, %c0_i32, %c0_i32_0 : i32, i32, i32
  }
  func.func @transform_1(%arg0: i32) -> (i32, i32) {
    %c0_i32 = arith.constant 0 : i32
    %c0_i32_0 = arith.constant 0 : i32
    %c0_i32_1 = arith.constant 0 : i32
    return %c0_i32, %c0_i32_0 : i32, i32
  }
  func.func @transform_2(%arg0: i32) -> (i32, i32) {
    %c0_i32 = arith.constant 0 : i32
    %c0_i32_0 = arith.constant 0 : i32
    %c0_i32_1 = arith.constant 0 : i32
    return %c0_i32, %c0_i32_0 : i32, i32
  }
  func.func @transform_3(%arg0: i32) -> (i32, i32) {
    %c0_i32 = arith.constant 0 : i32
    %c0_i32_0 = arith.constant 0 : i32
    %c0_i32_1 = arith.constant 0 : i32
    return %c0_i32, %c0_i32_0 : i32, i32
  }
  func.func @transform_4(%arg0: i32) -> (i32, i32) {
    %c0_i32 = arith.constant 0 : i32
    %c0_i32_0 = arith.constant 0 : i32
    %c0_i32_1 = arith.constant 0 : i32
    return %c0_i32, %c0_i32_0 : i32, i32
  }
  func.func @transform_5(%arg0: i32) -> (i32, i32, i32) {
    %c0_i32 = arith.constant 0 : i32
    %c0_i32_0 = arith.constant 0 : i32
    %c0_i32_1 = arith.constant 0 : i32
    return %arg0, %c0_i32, %c0_i32_0 : i32, i32, i32
  }
}

</mosaic_0001>

<bundles_post_ra>
// kernel: tpu_custom_call.1
= control target key start
LH: loop header
LB: loop body
LE: loop exit
PB: predicated region body
PF: predicated region fallthrough
CT: control target
= control target key end

     0   :  { %10 = vsyncpa [#allocation3], 0  ;;  %s1869_s0 = inlined_call_operand.hbm [shape: f32[2,8,32], index: 0, kind: input, shape index: {}]   ;;  %s1870_s1 = inlined_call_operand.hbm [shape: bf16[32,96], index: 1, kind: input, shape index: {}]   ;;  %s1871_s2 = inlined_call_operand.vmem [shape: f32[1,96], index: 2, kind: input, shape index: {}]   ;;  %s1872_s3 = inlined_call_operand.hbm [shape: bf16[32,32], index: 3, kind: input, shape index: {}]   ;;  %s1873_s4 = inlined_call_operand.vmem [shape: f32[1,32], index: 4, kind: input, shape index: {}]   ;;  %s1874_s5 = inlined_call_operand.hbm [shape: f32[2,8,32], index: 5, kind: output, shape index: {}]  }
   0x1   :  { %12 = vsyncpa [#allocation3 + $0x1], 0 }
   0x2   :  { %13 = vsyncpa [#allocation6], 0 }
   0x3   :  { %14 = vsyncpa [#allocation4], 0 }
   0x4   :  { %16 = vsyncpa [#allocation4 + $0x1], 0  ;;  %s1537_s18 = smov 0   ;;  %s1539_s19 = smov 0  }
   0x5   :  { %s1541_s20 = smov 0   ;;  %s1543_s21 = smov 0  }
   0x6 LB: > { %s1558_s22 = sadd.s32 4294967295, %s1486_s21   ;;  %s1090_s23 = sadd.s32 4294967294, %s1486_s21   ;;  %s1486_s21 = sphi %s1543_s21, %s1894_s21   ;;  %s1482_s20 = sphi %s1541_s20, %s1893_s20   ;;  %s1478_s19 = sphi %s1539_s19, %s1892_s19   ;;  %s1474_s18 = sphi %s1537_s18, %s1891_s18  }
   0x7   : > { %p42_p0 = scmp.ne.s32.totalorder %s1478_s19, %s1474_s18  ;;  %p1875_p1 = scmp.eq.s32.totalorder %s1558_s22, 0 }
   0x8   : > { %p156_p3 = scmp.eq.s32.totalorder %s1090_s23, 1  ;;  %p1091_p5 = scmp.ge.s32.totalorder %s1486_s21, 1 }
   0x9   : > { %p1567_p4 = por %p1875_p1, %p42_p0  ;;  %p163_p7 = scmp.lt.s32.totalorder %s1486_s21, 3 }
   0xa   : > { %p1572_p6 = por %p156_p3, %p42_p0  ;;  %s1488_s27 = smov [#allocation5]  }
   0xb   : > { %s1878_s24 = scalar_select %p1567_p4, 1, 0 }
   0xc   : > { %s1879_s25 = scalar_select %p1572_p6, 1, 0 }
   0xd   : > { %p1577_p8 = pnand %p1091_p5, %p163_p7  ;;  %s175_s28 = sshll.u32 %s1488_s27, 4  ;;  %s1581_s28 = int_to_ptr.vmem [resolvable:$true] %s175_s28 }
   0xe   : > { %s1489_s30 = smov [#allocation7]   ;;  %s1330_s9 = scalar_lea.hbm %s1870_s1, 256 }
   0xf   : > { %p1242_p9 = pneg %p1577_p8  ;;  %s191_s6 = sshll.u32 %s1489_s30, 4  ;;  %s1592_s6 = int_to_ptr.vmem [resolvable:$true] %s191_s6 }
  0x10   : > { %p1331_p12 = scmp.ne.s32.totalorder %s1870_s1, %s1330_s9  ;;  %p1337_p5 = scmp.lt.u32.totalorder %s1330_s9, %s1870_s1 }
  0x11   : > { %p1588_p11 = pnand %p1242_p9, %p1875_p1 }
  0x13   : > { %p1332_p13 = pneg %p1588_p11 }
  0x15   : > { %p1333_p0 = pnand %p1332_p13, %p1331_p12 }
  0x17   : > { %p1334_p3 = pneg %p1333_p0 }
  0x19   : > { %p1339_p7 = pnand %p1337_p5, %p1334_p3 }
  0x1b   : > { %1342 = shalt.err (!%p1339_p7)
}
  0x1c   : > { %s1343_s14 = scalar_lea.vmem %s1581_s28, 256  ;;  %p1351_p2 = scmp.lt.s32.totalorder %s1581_s28, %s1581_s28 }
  0x1d   : > { %p1344_p9 = scmp.ne.s32.totalorder %s1581_s28, %s1343_s14  ;;  %p1352_p12 = scmp.lt.s32.totalorder %s1343_s14, %s1343_s14 }
  0x1f   : > { %p1346_p10 = pnand %p1344_p9, %p1332_p13  ;;  %p1353_p0 = por %p1352_p12, %p1351_p2 }
  0x21   : > { %p1347_p1 = pneg %p1346_p10 }
  0x23   : > { %p1354_p6 = pnand %p1353_p0, %p1347_p1 }
  0x25   : > { %1357 = shalt.err (!%p1354_p6)
}
  0x26   : > { %s1490_s15 = smov 64   ;;  %s1491_s16 = smov 4  }
  0x27   : > { %1245 = dma.hbm_to_vmem [thread:$0]  (!%p1588_p11), %s1870_s1, 256, %s1581_s28, [#allocation6], %s1490_s15, %s1490_s15, %s1491_s16  }
  0x28   : > { %s1358_s7 = scalar_lea.hbm %s1872_s3, 256 }
  0x29   : > { %p1359_p2 = scmp.ne.s32.totalorder %s1872_s3, %s1358_s7  ;;  %p1365_p10 = scmp.lt.u32.totalorder %s1358_s7, %s1872_s3 }
  0x2b   : > { %p1361_p1 = pnand %p1359_p2, %p1332_p13 }
  0x2d   : > { %p1362_p6 = pneg %p1361_p1 }
  0x2f   : > { %p1367_p3 = pnand %p1365_p10, %p1362_p6 }
  0x31   : > { %1370 = shalt.err (!%p1367_p3)
}
  0x32   : > { %s1371_s28 = scalar_lea.vmem %s1592_s6, 256  ;;  %p1379_p12 = scmp.lt.s32.totalorder %s1592_s6, %s1592_s6 }
  0x33   : > { %p1372_p5 = scmp.ne.s32.totalorder %s1592_s6, %s1371_s28  ;;  %p1380_p0 = scmp.lt.s32.totalorder %s1371_s28, %s1371_s28 }
  0x35   : > { %p1374_p7 = pnand %p1372_p5, %p1332_p13  ;;  %p1381_p2 = por %p1380_p0, %p1379_p12 }
  0x37   : > { %p1375_p9 = pneg %p1374_p7 }
  0x39   : > { %p1382_p1 = pnand %p1381_p2, %p1375_p9 }
  0x3b   : > { %1385 = shalt.err (!%p1382_p1)
}
  0x3c   : > { %1248 = dma.hbm_to_vmem [thread:$0]  (!%p1588_p11), %s1872_s3, 256, %s1592_s6, [#allocation6], %s1490_s15, %s1490_s15, %s1491_s16  }
  0x3d   : > { %s1647_s14 = sadd.s32 1, %s1486_s21   ;;  %s29_s29 = sadd.s32 1, %s1482_s20 }
  0x3e   : > { %s26_s17 = ssub.s32 %s1486_s21, %s1647_s14  ;;  %p36_p13 = scmp.ne.s32.totalorder %s1482_s20, %s1478_s19 }
  0x3f   : > { %p27_p6 = scmp.eq.s32.totalorder %s26_s17, 0  ;;  %p37_p10 = scmp.eq.s32.totalorder %s1486_s21, 0 }
  0x40   : > { %p1882_p3 = scmp.eq.s32.totalorder %s1558_s22, 1  ;;  %p1259_p7 = scmp.lt.s32.totalorder %s1486_s21, 2 }
  0x41   : > { %s1663_s27 = scalar_select %p27_p6, %s1482_s20, %s29_s29  }
  0x42   : > { %p1657_p5 = por %p1882_p3, %p36_p13  ;;  %p38_p9 = por %p37_p10, %p36_p13 }
  0x43   : > { %s208_s30 = sand.u32 1, %s1482_s20   ;;  %s1096_s6 = sshll.u32 %s1486_s21, 7 }
  0x44   : > { %s1883_s23 = scalar_select %p1657_p5, 1, 0 }
  0x45   : > { %s1095_s7 = sshll.u32 %s208_s30, 3  ;;  %s1670_s8 = scalar_lea.hbm %s1869_s0, %s1096_s6 }
  0x46   : > { %s212_s9 = scalar_lea.vmem [#allocation2], %s1095_s7  ;;  %p1674_p11 = pnand %p1259_p7, %p38_p9 }
  0x47   : > { %s219_s10 = sshll.u32 %s212_s9, 4  ;;  %s209_s28 = scalar_lea.sflag [#allocation3], %s208_s30  ;;  %s1672_s10 = int_to_ptr.vmem [resolvable:$true] %s219_s10 }
  0x48   : > { %s1386_s12 = scalar_lea.hbm %s1670_s8, 128  ;;  %p1388_p0 = pneg %p1674_p11 }
  0x49   : > { %p1387_p12 = scmp.ne.s32.totalorder %s1670_s8, %s1386_s12  ;;  %s1391_s17 = scalar_lea.hbm %s1869_s0, 256 }
  0x4a   : > { %p1392_p13 = scmp.lt.u32.totalorder %s1670_s8, %s1869_s0  ;;  %p1393_p6 = scmp.lt.u32.totalorder %s1391_s17, %s1386_s12 }
  0x4b   : > { %p1389_p2 = pnand %p1388_p0, %p1387_p12  ;;  %p1395_p3 = scmp.lt.u32.totalorder %s1386_s12, %s1670_s8 }
  0x4c   : > { %p1394_p10 = por %p1393_p6, %p1392_p13 }
  0x4d   : > { %p1390_p1 = pneg %p1389_p2 }
  0x4e   : > { %p1396_p7 = por %p1395_p3, %p1394_p10 }
  0x50   : > { %p1397_p9 = pnand %p1396_p7, %p1390_p1 }
  0x52   : > { %1400 = shalt.err (!%p1397_p9)
}
  0x53   : > { %s1401_s30 = scalar_lea.vmem %s1672_s10, 128  ;;  %s1492_s15 = smov [#allocation2]  }
  0x54   : > { %p1402_p12 = scmp.ne.s32.totalorder %s1672_s10, %s1401_s30  ;;  %s1406_s16 = sshll.u32 %s1492_s15, 4  ;;  %s1407_s16 = int_to_ptr.vmem [resolvable:$false] %s1406_s16 }
  0x55   : > { %s1408_s9 = scalar_lea.vmem %s1407_s16, 256  ;;  %p1409_p4 = scmp.lt.s32.totalorder %s1672_s10, %s1407_s16 }
  0x56   : > { %p1404_p2 = pnand %p1402_p12, %p1388_p0  ;;  %p1410_p13 = scmp.lt.s32.totalorder %s1408_s9, %s1401_s30 }
  0x58   : > { %p1405_p5 = pneg %p1404_p2  ;;  %p1411_p6 = por %p1410_p13, %p1409_p4 }
  0x5a   : > { %p1412_p10 = pnand %p1411_p6, %p1405_p5 }
  0x5c   : > { %1415 = shalt.err (!%p1412_p10)
}
  0x5d   : > { %1252 = dma.hbm_to_vmem [thread:$0]  (!%p1674_p11), %s1670_s8, 128, %s1672_s10, %s209_s28  }
  0x5e   : > { %228 = sbr.rel (%p1577_p8) target bundleno = 2256 (0x8d0), region = 40  ;;  %s1706_s12 = sand.u32 (!%p1577_p8), 1, %s1478_s19  }
  0x5f   : > { %s1098_s13 = sshll.u32 (!%p1577_p8), %s1706_s12, 3  ;;  %s231_s29 = scalar_lea.sflag (!%p1577_p8), [#allocation3], %s1706_s12 }
  0x60   : > { %s234_s17 = scalar_lea.vmem (!%p1577_p8), [#allocation2], %s1098_s13  ;;  %p1885_p4 = scmp.ne.s32.totalorder (!%p1577_p8), %s1878_s24, 0 }
  0x65   : > { %1461 = dma.done.wait (%p1885_p4), %s231_s29, 128  }
  0x66   : > { %1463 = vsyncadd (%p1885_p4), %s231_s29, 4294967168  ;;  %p1886_p5 = scmp.eq.s32.totalorder %s1558_s22, 0 }
  0x68   : > { %1465 = dma.done.wait (%p1886_p5), [#allocation6], 512   ;;  %p1887_p8 = pmov %p1886_p5 }
  0x69   : > { %v1493_v0 = vmov 0.0   ;;  %vm1494_vm0 = vmmov 0   ;;  %v1312_v1 = vld [vmem:[#allocation5] sm:$0xff]   ;;  %v1313_v2 = vld [vmem:[#allocation5 + $0x8] sm:$0xff]   ;;  %v270_v3 = vld [vmem:[%s234_s17] sm:$0xff]  ;;  %vm295_vm1 = vcmask 261120  }
  0x6a   : > { %1467 = vsyncadd (%p1887_p8), [#allocation6], 4294966784  ;;  %1150 = vmatprep.subr.bf16.mxu0 %v1493_v0  ;;  %1154 = vmatprep.mubr.msk.bf16.mxu0 %vm1494_vm0, %v1493_v0  ;;  %v271_v4 = vpack.c.bf16 %v270_v3, %v270_v3  ;;  %v1102_v5 = vld [vmem:[%s1871_s2] ss:$0 sm:$0xff]  ;;  %s1495_s8 = smov 96   ;;  %s1496_s10 = smov 120  }
  0x6b   : > { %1158 = vmatprep.subr.bf16.mxu1 %v1493_v0  ;;  %1160 = vmatprep.mubr.msk.bf16.mxu1 %vm1494_vm0, %v1493_v0  ;;  %s1497_s11 = smov 88   ;;  %vm350_vm2 = vcmask 64512   ;;  %s1498_s28 = smov 56   ;;  %vm412_vm3 = vcmask 1043456   ;;  %v342_v45 = vld [vmem:[#allocation7] sm:$0xf] }
  0x6c   : > { %1151 = vmatpush3.bf16.msra.mxu0 %v1312_v1  ;;  %s1499_s7 = smov 64   ;;  %s1500_s6 = smov 80   ;;  %v621_v46 = vsel %vm412_vm3, %v342_v45, 0  ;;  %v343_v47 = vld [vmem:[#allocation7 + $0x4] sm:$0xf] }
  0x6d   : > { %1152 = vmatprep.subr.bf16.mxu0 %v1493_v0  ;;  %s1501_s30 = smov 112   ;;  %s1502_s15 = smov 72   ;;  %v575_v48 = vsel %vm412_vm3, %v343_v47, 0 }
  0x6e   : > { %s1503_s16 = smov 48   ;;  %s1504_s9 = smov 104  }
  0x6f   : > { %s1505_s29 = smov 40   ;;  %s1120_s26 = sshll.u32 %s1558_s22, 7 }
  0x70   : > { %1153 = vmatpush3.bf16.msra.mxu0 %v1313_v2  ;;  %s988_s22 = scalar_lea.sflag [#allocation4], %s1706_s12  ;;  %p1888_p0 = scmp.ne.s32.totalorder %s1883_s23, 0 }
  0x71   : > { %1164 = vmatprep.subr.bf16.mxu0 %v1493_v0 }
  0x73   : > { %1155 = vmatmul.mubr.msk.bf16.vlgmr.msra.gmra.mrb[0].mxu0 %vm295_vm1, %v271_v4 }
  0x74   : > { %1166 = vmatprep.mubr.msk.bf16.mxu0 %vm1494_vm0, %v1493_v0 }
 0x146   : > { %v333_v6 = vpop.f32.mrb[0].mxu0 }
 0x147   : > { %v334_v7 = vadd.f32 %v1102_v5, %v333_v6  ;;  %v1156_v8 = vpop.f32.mrb[1].mxu0 }
 0x148   : > { %v336_v9 = vpop.f32.mrb[2].mxu0 }
 0x149   : > { %v339_v10 = vmul.f32 0.17677669, %v334_v7  ;;  %v1734_v11 = vpack.c.bf16 %v334_v7, %v334_v7  ;;  %v1157_v12 = vpop.f32.mrb[3].mxu0 }
 0x14b   : > { %v1736_v13 = vpack.c.bf16 %v339_v10, %v339_v10  ;;  %348 = vrot.lane.b32.xlu0 %v1734_v11, %s1495_s8  ;;  %s268_s8 = scalar_lea.vmem [#allocation8], %s1098_s13 }
 0x14d   : > { %460 = vrot.lane.b32.xlu1 %v1736_v13, %s1496_s10  ;;  %s1001_s10 = sshll.u32 %s268_s8, 4  ;;  %s1826_s10 = int_to_ptr.vmem [resolvable:$true] %s1001_s10 }
 0x14e   : > { %s1416_s13 = scalar_lea.vmem %s1826_s10, 128 }
 0x14f   : > { %462 = vrot.lane.b32.xlu0 %v1734_v11, %s1497_s11  ;;  %p1417_p11 = scmp.ne.s32.totalorder %s1826_s10, %s1416_s13 }
 0x151   : > { %p1418_p1 = pnand %p1417_p11, %p1888_p0 }
 0x153   : > { %p1419_p3 = pneg %p1418_p1 }
 0x1bd   : > { %v349_v14 = vpop.permute.xlu0 %348 }
 0x1be   : > { %v355_v15 = vsel %vm350_vm2, %v349_v14, 0 }
 0x1bf   : > { %1159 = vmatpush3.bf16.xpose.msra.mxu1 %v355_v15  ;;  %v461_v18 = vpop.permute.xlu1 %460 }
 0x1c0   : > { %1170 = vmatprep.subr.bf16.mxu1 %v1493_v0 }
 0x1c1   : > { %v463_v16 = vpop.permute.xlu0 %462 }
 0x1c2   : > { %v468_v17 = vsel %vm350_vm2, %v463_v16, 0 }
 0x1c6   : > { %1161 = vmatmul.mubr.msk.bf16.vlgmr.msra.gmra.mrb[0].mxu1 %vm350_vm2, %v1736_v13 }
 0x1c7   : > { %1171 = vmatpush3.bf16.xpose.msra.mxu1 %v468_v17  ;;  %1172 = vmatprep.mubr.msk.bf16.mxu1 %vm1494_vm0, %v1493_v0 }
 0x1c8   : > { %1182 = vmatprep.subr.bf16.mxu1 %v1493_v0 }
 0x1ce   : > { %1173 = vmatmul.mubr.msk.bf16.vlgmr.msra.gmra.mrb[4].mxu1 %vm350_vm2, %v461_v18 }
 0x1cf   : > { %1184 = vmatprep.mubr.msk.bf16.mxu1 %vm1494_vm0, %v1493_v0  ;;  %1183 = vmatpush3.bf16.msra.mxu1 %v575_v48 }
 0x1d0   : > { %1194 = vmatprep.subr.bf16.mxu1 %v1493_v0 }
 0x299   : > { %v391_v19 = vpop.f32.mrb[0].mxu1 }
 0x29a   : > { %v1162_v20 = vpop.f32.mrb[1].mxu1  ;;  %v397_v21 = vsel %vm350_vm2, %v391_v19, -inf }
 0x29b   : > { %398 = vmax.xlane.f32.xlu1 %v397_v21  ;;  %v394_v22 = vpop.f32.mrb[2].mxu1 }
 0x29c   : > { %v1163_v23 = vpop.f32.mrb[3].mxu1 }
 0x2a1   : > { %v504_v24 = vpop.f32.mrb[4].mxu1 }
 0x2a2   : > { %v1174_v25 = vpop.f32.mrb[5].mxu1  ;;  %v510_v26 = vsel %vm350_vm2, %v504_v24, -inf }
 0x2a3   : > { %511 = vmax.xlane.f32.xlu0 %v510_v26  ;;  %v507_v27 = vpop.f32.mrb[6].mxu1 }
 0x2a4   : > { %v1175_v28 = vpop.f32.mrb[7].mxu1 }
 0x2ac   : > { %520 = vrot.lane.b32.xlu1 %v1734_v11, %s1498_s28 }
 0x2b9   : > { %407 = vrot.lane.b32.xlu0 %v1734_v11, %s1499_s7  ;;  %s1824_s7 = scalar_lea.hbm %s1874_s5, %s1120_s26 }
 0x2bd   : > { %665 = vrot.lane.b32.xlu0 %v1734_v11, %s1500_s6  ;;  %s1506_s6 = smov [#allocation8]  }
 0x2c1   : > { %663 = vrot.lane.b32.xlu0 %v1736_v13, %s1501_s30  ;;  %s1420_s30 = sshll.u32 %s1506_s6, 4  ;;  %s1421_s30 = int_to_ptr.vmem [resolvable:$false] %s1420_s30 }
 0x2c2   : > { %p1423_p7 = scmp.lt.s32.totalorder %s1826_s10, %s1421_s30 }
 0x328   : > { %v399_v29 = vpop.xlane.xlu1 %398 }
 0x329   : > { %v400_v30 = vsub.f32 %v391_v19, %v399_v29 }
 0x32b   : > { %v401_v31 = vmul.f32 1.442695, %v400_v30 }
 0x32c   : > { %v521_v38 = vpop.permute.xlu1 %520 }
 0x32d   : > { %1314 = vpow2.f32 %v401_v31  ;;  %v526_v41 = vsel %vm412_vm3, %v521_v38, 0  ;;  %v344_v31 = vld [vmem:[#allocation7 + $0x8] sm:$0xf] }
 0x330   : > { %v512_v32 = vpop.xlane.xlu0 %511 }
 0x331   : > { %v513_v33 = vsub.f32 %v504_v24, %v512_v32  ;;  %v778_v32 = vsel %vm412_vm3, %v344_v31, 0 }
 0x333   : > { %v514_v34 = vmul.f32 1.442695, %v513_v33 }
 0x334   : > { %v408_v35 = vpop.permute.xlu0 %407 }
 0x335   : > { %1316 = vpow2.f32 %v514_v34  ;;  %v414_v36 = vsel %vm412_vm3, %v408_v35, 0 }
 0x336   : > { %1165 = vmatpush3.bf16.msra.mxu0 %v414_v36 }
 0x337   : > { %v1315_v37 = vpop.eup %1314  ;;  %1176 = vmatprep.subr.bf16.mxu0 %v1493_v0 }
 0x338   : > { %v403_v39 = vsel %vm350_vm2, %v1315_v37, 0.0  ;;  %v406_v40 = vpack.c.bf16 %v1315_v37, %v1315_v37  ;;  %v666_v49 = vpop.permute.xlu0 %665 }
 0x339   : > { %404 = vadd.xlane.f32.xlu0 %v403_v39  ;;  %v671_v4 = vsel %vm350_vm2, %v666_v49, 0 }
 0x33a   : > { %1167 = vmatmul.mubr.msk.bf16.vlgmr.msra.gmra.mrb[4].mxu0 %vm350_vm2, %v406_v40 }
 0x33b   : > { %1177 = vmatpush3.bf16.msra.mxu0 %v526_v41  ;;  %1178 = vmatprep.mubr.msk.bf16.mxu0 %vm1494_vm0, %v1493_v0 }
 0x33c   : > { %1188 = vmatprep.subr.bf16.mxu0 %v1493_v0  ;;  %v664_v50 = vpop.permute.xlu0 %663 }
 0x33f   : > { %v1317_v42 = vpop.eup %1316 }
 0x340   : > { %v516_v43 = vsel %vm350_vm2, %v1317_v42, 0.0  ;;  %v519_v44 = vpack.c.bf16 %v1317_v42, %v1317_v42 }
 0x341   : > { %517 = vadd.xlane.f32.xlu1 %v516_v43 }
 0x342   : > { %1179 = vmatmul.mubr.msk.bf16.vlgmr.msra.gmra.mrb[8].mxu0 %vm350_vm2, %v519_v44 }
 0x343   : > { %1190 = vmatprep.mubr.msk.bf16.mxu0 %vm1494_vm0, %v1493_v0  ;;  %1189 = vmatpush3.bf16.msra.mxu0 %v621_v46 }
 0x344   : > { %1200 = vmatprep.subr.bf16.mxu0 %v1493_v0 }
 0x34f   : > { %823 = vrot.lane.b32.xlu0 %v1734_v11, %s1502_s15  ;;  %s1422_s15 = scalar_lea.vmem %s1421_s30, 256 }
 0x350   : > { %p1424_p9 = scmp.lt.s32.totalorder %s1422_s15, %s1416_s13 }
 0x352   : > { %p1425_p12 = por %p1424_p9, %p1423_p7 }
 0x354   : > { %p1426_p2 = pnand %p1425_p12, %p1419_p3 }
 0x3c6   : > { %v405_v51 = vpop.xlane.xlu0 %404 }
 0x3c7   : > { %1318 = vrcp.f32 %v405_v51 }
 0x3ca   : > { %v824_v27 = vpop.permute.xlu0 %823 }
 0x3cb   : > { %v829_v30 = vsel %vm350_vm2, %v824_v27, 0 }
 0x3ce   : > { %v518_v52 = vpop.xlane.xlu1 %517 }
 0x3cf   : > { %1320 = vrcp.f32 %v518_v52 }
 0x3d1   : > { %v1319_v53 = vpop.eup %1318 }
 0x3d9   : > { %v1321_v60 = vpop.eup %1320 }
 0x40d   : > { %v450_v54 = vpop.f32.mrb[4].mxu0 }
 0x40e   : > { %v457_v55 = vmul.f32 %v1319_v53, %v450_v54  ;;  %v1168_v56 = vpop.f32.mrb[5].mxu0 }
 0x40f   : > { %v453_v57 = vpop.f32.mrb[6].mxu0 }
 0x410   : > { %v458_v58 = vpack.c.bf16 %v457_v55, %v457_v55  ;;  %v1169_v59 = vpop.f32.mrb[7].mxu0  ;;  %v345_v57 = vld [vmem:[#allocation7 + $0xc] sm:$0xf] }
 0x412   : > { %1191 = vmatmul.mubr.msk.bf16.vlgmr.msra.gmra.mrb[12].mxu0 %vm350_vm2, %v458_v58  ;;  %v936_v58 = vsel %vm412_vm3, %v345_v57, 0 }
 0x413   : > { %1202 = vmatprep.mubr.msk.bf16.mxu0 %vm1494_vm0, %v1493_v0 }
 0x415   : > { %v562_v61 = vpop.f32.mrb[8].mxu0 }
 0x416   : > { %v569_v62 = vmul.f32 %v1321_v60, %v562_v61  ;;  %v1180_v63 = vpop.f32.mrb[9].mxu0 }
 0x417   : > { %v565_v1 = vpop.f32.mrb[10].mxu0 }
 0x418   : > { %v570_v2 = vpack.c.bf16 %v569_v62, %v569_v62  ;;  %v1181_v3 = vpop.f32.mrb[11].mxu0 }
 0x41a   : > { %1185 = vmatmul.mubr.msk.bf16.vlgmr.msra.gmra.mrb[8].mxu1 %vm350_vm2, %v570_v2 }
 0x41b   : > { %1195 = vmatpush3.bf16.xpose.msra.mxu1 %v671_v4  ;;  %1196 = vmatprep.mubr.msk.bf16.mxu1 %vm1494_vm0, %v1493_v0  ;;  %v1118_v4 = vld [vmem:[%s1873_s4] ss:$0 sm:$0xff] }
 0x41c   : > { %1206 = vmatprep.subr.bf16.mxu1 %v1493_v0 }
 0x422   : > { %1197 = vmatmul.mubr.msk.bf16.vlgmr.msra.gmra.mrb[12].mxu1 %vm350_vm2, %v664_v50 }
 0x423   : > { %1208 = vmatprep.mubr.msk.bf16.mxu1 %vm1494_vm0, %v1493_v0  ;;  %1207 = vmatpush3.bf16.msra.mxu1 %v778_v32 }
 0x424   : > { %1218 = vmatprep.subr.bf16.mxu1 %v1493_v0 }
 0x4e5   : > { %v657_v5 = vpop.f32.mrb[12].mxu0 }
 0x4e6   : > { %v1192_v6 = vpop.f32.mrb[13].mxu0 }
 0x4e7   : > { %v660_v7 = vpop.f32.mrb[14].mxu0 }
 0x4e8   : > { %v1193_v8 = vpop.f32.mrb[15].mxu0 }
 0x4ed   : > { %v611_v9 = vpop.f32.mrb[8].mxu1 }
 0x4ee   : > { %v1786_v10 = vadd.f32 %v657_v5, %v611_v9  ;;  %v1186_v12 = vpop.f32.mrb[9].mxu1 }
 0x4ef   : > { %v614_v14 = vpop.f32.mrb[10].mxu1 }
 0x4f0   : > { %v1187_v15 = vpop.f32.mrb[11].mxu1 }
 0x4f5   : > { %v707_v16 = vpop.f32.mrb[12].mxu1 }
 0x4f6   : > { %v1198_v17 = vpop.f32.mrb[13].mxu1  ;;  %v713_v18 = vsel %vm350_vm2, %v707_v16, -inf }
 0x4f7   : > { %714 = vmax.xlane.f32.xlu1 %v713_v18  ;;  %v710_v19 = vpop.f32.mrb[14].mxu1 }
 0x4f8   : > { %v1199_v20 = vpop.f32.mrb[15].mxu1 }
 0x508   : > { %723 = vrot.lane.b32.xlu1 %v1734_v11, %s1503_s16 }
 0x50c   : > { %821 = vrot.lane.b32.xlu1 %v1736_v13, %s1504_s9 }
 0x584   : > { %v715_v21 = vpop.xlane.xlu1 %714 }
 0x585   : > { %v716_v22 = vsub.f32 %v707_v16, %v715_v21 }
 0x587   : > { %v717_v23 = vmul.f32 1.442695, %v716_v22 }
 0x588   : > { %v724_v24 = vpop.permute.xlu1 %723 }
 0x589   : > { %1322 = vpow2.f32 %v717_v23  ;;  %v729_v25 = vsel %vm412_vm3, %v724_v24, 0 }
 0x58a   : > { %1201 = vmatpush3.bf16.msra.mxu0 %v729_v25 }
 0x58b   : > { %1212 = vmatprep.subr.bf16.mxu0 %v1493_v0 }
 0x58c   : > { %v822_v13 = vpop.permute.xlu1 %821 }
 0x593   : > { %v1323_v26 = vpop.eup %1322 }
 0x594   : > { %v719_v28 = vsel %vm350_vm2, %v1323_v26, 0.0  ;;  %v722_v29 = vpack.c.bf16 %v1323_v26, %v1323_v26 }
 0x595   : > { %720 = vadd.xlane.f32.xlu1 %v719_v28 }
 0x596   : > { %1203 = vmatmul.mubr.msk.bf16.vlgmr.msra.gmra.mrb[16].mxu0 %vm350_vm2, %v722_v29 }
 0x597   : > { %1213 = vmatpush3.bf16.xpose.msra.mxu0 %v829_v30  ;;  %1214 = vmatprep.mubr.msk.bf16.mxu0 %vm1494_vm0, %v1493_v0 }
 0x598   : > { %1224 = vmatprep.subr.bf16.mxu0 %v1493_v0 }
 0x59e   : > { %1215 = vmatmul.mubr.msk.bf16.vlgmr.msra.gmra.mrb[20].mxu0 %vm350_vm2, %v822_v13 }
 0x59f   : > { %1226 = vmatprep.mubr.msk.bf16.mxu0 %vm1494_vm0, %v1493_v0  ;;  %1225 = vmatpush3.bf16.msra.mxu0 %v936_v58 }
 0x622   : > { %v721_v33 = vpop.xlane.xlu1 %720 }
 0x623   : > { %1324 = vrcp.f32 %v721_v33 }
 0x62d   : > { %v1325_v34 = vpop.eup %1324 }
 0x669   : > { %v765_v35 = vpop.f32.mrb[16].mxu0 }
 0x66a   : > { %v772_v36 = vmul.f32 %v1325_v34, %v765_v35  ;;  %v1204_v37 = vpop.f32.mrb[17].mxu0 }
 0x66b   : > { %v768_v38 = vpop.f32.mrb[18].mxu0 }
 0x66c   : > { %v773_v39 = vpack.c.bf16 %v772_v36, %v772_v36  ;;  %v1205_v40 = vpop.f32.mrb[19].mxu0 }
 0x66e   : > { %1209 = vmatmul.mubr.msk.bf16.vlgmr.msra.gmra.mrb[16].mxu1 %vm350_vm2, %v773_v39 }
 0x66f   : > { %1220 = vmatprep.mubr.msk.bf16.mxu1 %vm1494_vm0, %v1493_v0 }
 0x671   : > { %v865_v41 = vpop.f32.mrb[20].mxu0 }
 0x672   : > { %v1216_v42 = vpop.f32.mrb[21].mxu0  ;;  %v871_v43 = vsel %vm350_vm2, %v865_v41, -inf }
 0x673   : > { %872 = vmax.xlane.f32.xlu0 %v871_v43  ;;  %v868_v44 = vpop.f32.mrb[22].mxu0 }
 0x674   : > { %v1217_v45 = vpop.f32.mrb[23].mxu0 }
 0x689   : > { %881 = vrot.lane.b32.xlu0 %v1734_v11, %s1505_s29 }
 0x700   : > { %v873_v46 = vpop.xlane.xlu0 %872 }
 0x701   : > { %v874_v47 = vsub.f32 %v865_v41, %v873_v46 }
 0x703   : > { %v875_v48 = vmul.f32 1.442695, %v874_v47 }
 0x704   : > { %v882_v49 = vpop.permute.xlu0 %881 }
 0x705   : > { %1326 = vpow2.f32 %v875_v48  ;;  %v887_v50 = vsel %vm412_vm3, %v882_v49, 0 }
 0x706   : > { %1219 = vmatpush3.bf16.msra.mxu1 %v887_v50 }
 0x70f   : > { %v1327_v51 = vpop.eup %1326 }
 0x710   : > { %v877_v0 = vsel %vm350_vm2, %v1327_v51, 0.0  ;;  %v880_v52 = vpack.c.bf16 %v1327_v51, %v1327_v51 }
 0x711   : > { %878 = vadd.xlane.f32.xlu1 %v877_v0 }
 0x712   : > { %1221 = vmatmul.mubr.msk.bf16.vlgmr.msra.gmra.mrb[20].mxu1 %vm350_vm2, %v880_v52 }
 0x741   : > { %v814_v53 = vpop.f32.mrb[16].mxu1 }
 0x742   : > { %v820_v54 = vadd.f32 %v814_v53, %v1786_v10  ;;  %v1210_v55 = vpop.f32.mrb[17].mxu1 }
 0x743   : > { %v817_v11 = vpop.f32.mrb[18].mxu1 }
 0x744   : > { %v1211_v56 = vpop.f32.mrb[19].mxu1 }
 0x79e   : > { %v879_v59 = vpop.xlane.xlu1 %878 }
 0x79f   : > { %1328 = vrcp.f32 %v879_v59 }
 0x7a9   : > { %v1329_v60 = vpop.eup %1328 }
 0x7e5   : > { %v923_v61 = vpop.f32.mrb[20].mxu1 }
 0x7e6   : > { %v930_v62 = vmul.f32 %v1329_v60, %v923_v61  ;;  %v1222_v63 = vpop.f32.mrb[21].mxu1 }
 0x7e7   : > { %v926_v1 = vpop.f32.mrb[22].mxu1 }
 0x7e8   : > { %v931_v2 = vpack.c.bf16 %v930_v62, %v930_v62  ;;  %v1223_v3 = vpop.f32.mrb[23].mxu1 }
 0x7ea   : > { %1227 = vmatmul.mubr.msk.bf16.vlgmr.msra.gmra.mrb[24].mxu0 %vm350_vm2, %v931_v2 }
 0x8bd   : > { %v972_v5 = vpop.f32.mrb[24].mxu0 }
 0x8be   : > { %v978_v6 = vadd.f32 %v972_v5, %v820_v54  ;;  %v1228_v7 = vpop.f32.mrb[25].mxu0 }
 0x8bf   : > { %v975_v8 = vpop.f32.mrb[26].mxu0 }
 0x8c0   : > { %v985_v9 = vadd.f32 %v1118_v4, %v978_v6  ;;  %v1229_v10 = vpop.f32.mrb[27].mxu0 }
 0x8c2   : > { %986 = vst.msk [vmem:[%s268_s8] sm:$0xff] %vm295_vm1, %v985_v9 }
 0x8c3   : > { %1429 = shalt.err (!%p1426_p2)
}
 0x8c4   : > { %s1430_s12 = scalar_lea.hbm %s1824_s7, 128  ;;  %s1434_s29 = scalar_lea.hbm %s1874_s5, 256 }
 0x8c5   : > { %p1431_p13 = scmp.ne.s32.totalorder %s1824_s7, %s1430_s12  ;;  %p1435_p4 = scmp.lt.u32.totalorder %s1824_s7, %s1874_s5 }
 0x8c6   : > { %p1436_p5 = scmp.lt.u32.totalorder %s1434_s29, %s1430_s12  ;;  %p1438_p11 = scmp.lt.u32.totalorder %s1430_s12, %s1824_s7 }
 0x8c7   : > { %p1432_p6 = pnand %p1431_p13, %p1888_p0 }
 0x8c8   : > { %p1437_p8 = por %p1436_p5, %p1435_p4 }
 0x8c9   : > { %p1433_p10 = pneg %p1432_p6 }
 0x8ca   : > { %p1439_p1 = por %p1438_p11, %p1437_p8 }
 0x8cc   : > { %p1440_p3 = pnand %p1439_p1, %p1433_p10 }
 0x8ce   : > { %1443 = shalt.err (!%p1440_p3)
}
 0x8cf   : > { %1240 = dma.vmem_to_hbm [thread:$0]  (%p1888_p0), %s1826_s10, 128, %s1824_s7, %s988_s22  }
 0x8d0 PF: > { %s1013_s26 = sand.u32 1, %s1474_s18   ;;  %p1889_p7 = scmp.ne.s32.totalorder %s1879_s25, 0 }
 0x8d1   : > { %p1890_p9 = scmp.ge.s32.totalorder %s1486_s21, 2  ;;  %s1014_s8 = scalar_lea.sflag [#allocation4], %s1013_s26 }
 0x8d3   : > { %p1254_p12 = pnand %p1890_p9, %p1889_p7 }
 0x8d5   : > { %1469 = dma.done.wait (!%p1254_p12), %s1014_s8, 128  }
 0x8d6   : > { %1471 = vsyncadd (!%p1254_p12), %s1014_s8, 4294967168  ;;  %p19_p2 = scmp.ge.s32.totalorder %s1647_s14, 4   ;;  %s1891_s18 = smov %s1478_s19 }
 0x8d7   : > { %s1892_s19 = smov %s1482_s20  ;;  %s1893_s20 = smov %s1663_s27 }
 0x8d8   : > { %s1894_s21 = smov %s1647_s14  ;;  %21 = sbr.rel (!%p19_p2) target bundleno = 6 (0x6), region = 93 }
 0x8df   :  { %1019 = vsyncpa [#allocation3], 1 }
 0x8e0   :  { %1021 = vsyncpa [#allocation3 + $0x1], 1 }
 0x8e1   :  { %1022 = vsyncpa [#allocation6], 1 }
 0x8e2   :  { %1023 = vsyncpa [#allocation4], 1 }
 0x8e3   :  { %1025 = vsyncpa [#allocation4 + $0x1], 1 }

// kernel: tpu_custom_call.1
= control target key start
LH: loop header
LB: loop body
LE: loop exit
PB: predicated region body
PF: predicated region fallthrough
CT: control target
= control target key end

     0   :  { %10 = vsyncpa [#allocation3], 0  ;;  %s1869_s0 = inlined_call_operand.hbm [shape: f32[2,8,32], index: 0, kind: input, shape index: {}]   ;;  %s1870_s1 = inlined_call_operand.hbm [shape: bf16[32,96], index: 1, kind: input, shape index: {}]   ;;  %s1871_s2 = inlined_call_operand.vmem [shape: f32[1,96], index: 2, kind: input, shape index: {}]   ;;  %s1872_s3 = inlined_call_operand.hbm [shape: bf16[32,32], index: 3, kind: input, shape index: {}]   ;;  %s1873_s4 = inlined_call_operand.vmem [shape: f32[1,32], index: 4, kind: input, shape index: {}]   ;;  %s1874_s5 = inlined_call_operand.hbm [shape: f32[2,8,32], index: 5, kind: output, shape index: {}]  }
   0x1   :  { %12 = vsyncpa [#allocation3 + $0x1], 0 }
   0x2   :  { %13 = vsyncpa [#allocation6], 0 }
   0x3   :  { %14 = vsyncpa [#allocation4], 0 }
   0x4   :  { %16 = vsyncpa [#allocation4 + $0x1], 0  ;;  %s1537_s18 = smov 0   ;;  %s1539_s19 = smov 0  }
   0x5   :  { %s1541_s20 = smov 0   ;;  %s1543_s21 = smov 0  }
   0x6 LB: > { %s1558_s22 = sadd.s32 4294967295, %s1486_s21   ;;  %s1090_s23 = sadd.s32 4294967294, %s1486_s21   ;;  %s1486_s21 = sphi %s1543_s21, %s1894_s21   ;;  %s1482_s20 = sphi %s1541_s20, %s1893_s20   ;;  %s1478_s19 = sphi %s1539_s19, %s1892_s19   ;;  %s1474_s18 = sphi %s1537_s18, %s1891_s18  }
   0x7   : > { %p42_p0 = scmp.ne.s32.totalorder %s1478_s19, %s1474_s18  ;;  %p1875_p1 = scmp.eq.s32.totalorder %s1558_s22, 0 }
   0x8   : > { %p156_p3 = scmp.eq.s32.totalorder %s1090_s23, 1  ;;  %p1091_p5 = scmp.ge.s32.totalorder %s1486_s21, 1 }
   0x9   : > { %p1567_p4 = por %p1875_p1, %p42_p0  ;;  %p163_p7 = scmp.lt.s32.totalorder %s1486_s21, 3 }
   0xa   : > { %p1572_p6 = por %p156_p3, %p42_p0  ;;  %s1488_s27 = smov [#allocation5]  }
   0xb   : > { %s1878_s24 = scalar_select %p1567_p4, 1, 0 }
   0xc   : > { %s1879_s25 = scalar_select %p1572_p6, 1, 0 }
   0xd   : > { %p1577_p8 = pnand %p1091_p5, %p163_p7  ;;  %s175_s28 = sshll.u32 %s1488_s27, 4  ;;  %s1581_s28 = int_to_ptr.vmem [resolvable:$true] %s175_s28 }
   0xe   : > { %s1489_s30 = smov [#allocation7]   ;;  %s1330_s9 = scalar_lea.hbm %s1870_s1, 256 }
   0xf   : > { %p1242_p9 = pneg %p1577_p8  ;;  %s191_s6 = sshll.u32 %s1489_s30, 4  ;;  %s1592_s6 = int_to_ptr.vmem [resolvable:$true] %s191_s6 }
  0x10   : > { %p1331_p12 = scmp.ne.s32.totalorder %s1870_s1, %s1330_s9  ;;  %p1337_p5 = scmp.lt.u32.totalorder %s1330_s9, %s1870_s1 }
  0x11   : > { %p1588_p11 = pnand %p1242_p9, %p1875_p1 }
  0x13   : > { %p1332_p13 = pneg %p1588_p11 }
  0x15   : > { %p1333_p0 = pnand %p1332_p13, %p1331_p12 }
  0x17   : > { %p1334_p3 = pneg %p1333_p0 }
  0x19   : > { %p1339_p7 = pnand %p1337_p5, %p1334_p3 }
  0x1b   : > { %1342 = shalt.err (!%p1339_p7)
}
  0x1c   : > { %s1343_s14 = scalar_lea.vmem %s1581_s28, 256  ;;  %p1351_p2 = scmp.lt.s32.totalorder %s1581_s28, %s1581_s28 }
  0x1d   : > { %p1344_p9 = scmp.ne.s32.totalorder %s1581_s28, %s1343_s14  ;;  %p1352_p12 = scmp.lt.s32.totalorder %s1343_s14, %s1343_s14 }
  0x1f   : > { %p1346_p10 = pnand %p1344_p9, %p1332_p13  ;;  %p1353_p0 = por %p1352_p12, %p1351_p2 }
  0x21   : > { %p1347_p1 = pneg %p1346_p10 }
  0x23   : > { %p1354_p6 = pnand %p1353_p0, %p1347_p1 }
  0x25   : > { %1357 = shalt.err (!%p1354_p6)
}
  0x26   : > { %s1490_s15 = smov 64   ;;  %s1491_s16 = smov 4  }
  0x27   : > { %1245 = dma.hbm_to_vmem [thread:$0]  (!%p1588_p11), %s1870_s1, 256, %s1581_s28, [#allocation6], %s1490_s15, %s1490_s15, %s1491_s16  }
  0x28   : > { %s1358_s7 = scalar_lea.hbm %s1872_s3, 256 }
  0x29   : > { %p1359_p2 = scmp.ne.s32.totalorder %s1872_s3, %s1358_s7  ;;  %p1365_p10 = scmp.lt.u32.totalorder %s1358_s7, %s1872_s3 }
  0x2b   : > { %p1361_p1 = pnand %p1359_p2, %p1332_p13 }
  0x2d   : > { %p1362_p6 = pneg %p1361_p1 }
  0x2f   : > { %p1367_p3 = pnand %p1365_p10, %p1362_p6 }
  0x31   : > { %1370 = shalt.err (!%p1367_p3)
}
  0x32   : > { %s1371_s28 = scalar_lea.vmem %s1592_s6, 256  ;;  %p1379_p12 = scmp.lt.s32.totalorder %s1592_s6, %s1592_s6 }
  0x33   : > { %p1372_p5 = scmp.ne.s32.totalorder %s1592_s6, %s1371_s28  ;;  %p1380_p0 = scmp.lt.s32.totalorder %s1371_s28, %s1371_s28 }
  0x35   : > { %p1374_p7 = pnand %p1372_p5, %p1332_p13  ;;  %p1381_p2 = por %p1380_p0, %p1379_p12 }
  0x37   : > { %p1375_p9 = pneg %p1374_p7 }
  0x39   : > { %p1382_p1 = pnand %p1381_p2, %p1375_p9 }
  0x3b   : > { %1385 = shalt.err (!%p1382_p1)
}
  0x3c   : > { %1248 = dma.hbm_to_vmem [thread:$0]  (!%p1588_p11), %s1872_s3, 256, %s1592_s6, [#allocation6], %s1490_s15, %s1490_s15, %s1491_s16  }
  0x3d   : > { %s1647_s14 = sadd.s32 1, %s1486_s21   ;;  %s29_s29 = sadd.s32 1, %s1482_s20 }
  0x3e   : > { %s26_s17 = ssub.s32 %s1486_s21, %s1647_s14  ;;  %p36_p13 = scmp.ne.s32.totalorder %s1482_s20, %s1478_s19 }
  0x3f   : > { %p27_p6 = scmp.eq.s32.totalorder %s26_s17, 0  ;;  %p37_p10 = scmp.eq.s32.totalorder %s1486_s21, 0 }
  0x40   : > { %p1882_p3 = scmp.eq.s32.totalorder %s1558_s22, 1  ;;  %p1259_p7 = scmp.lt.s32.totalorder %s1486_s21, 2 }
  0x41   : > { %s1663_s27 = scalar_select %p27_p6, %s1482_s20, %s29_s29  }
  0x42   : > { %p1657_p5 = por %p1882_p3, %p36_p13  ;;  %p38_p9 = por %p37_p10, %p36_p13 }
  0x43   : > { %s208_s30 = sand.u32 1, %s1482_s20   ;;  %s1096_s6 = sshll.u32 %s1486_s21, 7 }
  0x44   : > { %s1883_s23 = scalar_select %p1657_p5, 1, 0 }
  0x45   : > { %s1095_s7 = sshll.u32 %s208_s30, 3  ;;  %s1670_s8 = scalar_lea.hbm %s1869_s0, %s1096_s6 }
  0x46   : > { %s212_s9 = scalar_lea.vmem [#allocation2], %s1095_s7  ;;  %p1674_p11 = pnand %p1259_p7, %p38_p9 }
  0x47   : > { %s219_s10 = sshll.u32 %s212_s9, 4  ;;  %s209_s28 = scalar_lea.sflag [#allocation3], %s208_s30  ;;  %s1672_s10 = int_to_ptr.vmem [resolvable:$true] %s219_s10 }
  0x48   : > { %s1386_s12 = scalar_lea.hbm %s1670_s8, 128  ;;  %p1388_p0 = pneg %p1674_p11 }
  0x49   : > { %p1387_p12 = scmp.ne.s32.totalorder %s1670_s8, %s1386_s12  ;;  %s1391_s17 = scalar_lea.hbm %s1869_s0, 256 }
  0x4a   : > { %p1392_p13 = scmp.lt.u32.totalorder %s1670_s8, %s1869_s0  ;;  %p1393_p6 = scmp.lt.u32.totalorder %s1391_s17, %s1386_s12 }
  0x4b   : > { %p1389_p2 = pnand %p1388_p0, %p1387_p12  ;;  %p1395_p3 = scmp.lt.u32.totalorder %s1386_s12, %s1670_s8 }
  0x4c   : > { %p1394_p10 = por %p1393_p6, %p1392_p13 }
  0x4d   : > { %p1390_p1 = pneg %p1389_p2 }
  0x4e   : > { %p1396_p7 = por %p1395_p3, %p1394_p10 }
  0x50   : > { %p1397_p9 = pnand %p1396_p7, %p1390_p1 }
  0x52   : > { %1400 = shalt.err (!%p1397_p9)
}
  0x53   : > { %s1401_s30 = scalar_lea.vmem %s1672_s10, 128  ;;  %s1492_s15 = smov [#allocation2]  }
  0x54   : > { %p1402_p12 = scmp.ne.s32.totalorder %s1672_s10, %s1401_s30  ;;  %s1406_s16 = sshll.u32 %s1492_s15, 4  ;;  %s1407_s16 = int_to_ptr.vmem [resolvable:$false] %s1406_s16 }
  0x55   : > { %s1408_s9 = scalar_lea.vmem %s1407_s16, 256  ;;  %p1409_p4 = scmp.lt.s32.totalorder %s1672_s10, %s1407_s16 }
  0x56   : > { %p1404_p2 = pnand %p1402_p12, %p1388_p0  ;;  %p1410_p13 = scmp.lt.s32.totalorder %s1408_s9, %s1401_s30 }
  0x58   : > { %p1405_p5 = pneg %p1404_p2  ;;  %p1411_p6 = por %p1410_p13, %p1409_p4 }
  0x5a   : > { %p1412_p10 = pnand %p1411_p6, %p1405_p5 }
  0x5c   : > { %1415 = shalt.err (!%p1412_p10)
}
  0x5d   : > { %1252 = dma.hbm_to_vmem [thread:$0]  (!%p1674_p11), %s1670_s8, 128, %s1672_s10, %s209_s28  }
  0x5e   : > { %228 = sbr.rel (%p1577_p8) target bundleno = 2256 (0x8d0), region = 40  ;;  %s1706_s12 = sand.u32 (!%p1577_p8), 1, %s1478_s19  }
  0x5f   : > { %s1098_s13 = sshll.u32 (!%p1577_p8), %s1706_s12, 3  ;;  %s231_s29 = scalar_lea.sflag (!%p1577_p8), [#allocation3], %s1706_s12 }
  0x60   : > { %s234_s17 = scalar_lea.vmem (!%p1577_p8), [#allocation2], %s1098_s13  ;;  %p1885_p4 = scmp.ne.s32.totalorder (!%p1577_p8), %s1878_s24, 0 }
  0x65   : > { %1461 = dma.done.wait (%p1885_p4), %s231_s29, 128  }
  0x66   : > { %1463 = vsyncadd (%p1885_p4), %s231_s29, 4294967168  ;;  %p1886_p5 = scmp.eq.s32.totalorder %s1558_s22, 0 }
  0x68   : > { %1465 = dma.done.wait (%p1886_p5), [#allocation6], 512   ;;  %p1887_p8 = pmov %p1886_p5 }
  0x69   : > { %v1493_v0 = vmov 0.0   ;;  %vm1494_vm0 = vmmov 0   ;;  %v1312_v1 = vld [vmem:[#allocation5] sm:$0xff]   ;;  %v1313_v2 = vld [vmem:[#allocation5 + $0x8] sm:$0xff]   ;;  %v270_v3 = vld [vmem:[%s234_s17] sm:$0xff]  ;;  %vm295_vm1 = vcmask 261120  }
  0x6a   : > { %1467 = vsyncadd (%p1887_p8), [#allocation6], 4294966784  ;;  %1150 = vmatprep.subr.bf16.mxu0 %v1493_v0  ;;  %1154 = vmatprep.mubr.msk.bf16.mxu0 %vm1494_vm0, %v1493_v0  ;;  %v271_v4 = vpack.c.bf16 %v270_v3, %v270_v3  ;;  %v1102_v5 = vld [vmem:[%s1871_s2] ss:$0 sm:$0xff]  ;;  %s1495_s8 = smov 96   ;;  %s1496_s10 = smov 120  }
  0x6b   : > { %1158 = vmatprep.subr.bf16.mxu1 %v1493_v0  ;;  %1160 = vmatprep.mubr.msk.bf16.mxu1 %vm1494_vm0, %v1493_v0  ;;  %s1497_s11 = smov 88   ;;  %vm350_vm2 = vcmask 64512   ;;  %s1498_s28 = smov 56   ;;  %vm412_vm3 = vcmask 1043456   ;;  %v342_v45 = vld [vmem:[#allocation7] sm:$0xf] }
  0x6c   : > { %1151 = vmatpush3.bf16.msra.mxu0 %v1312_v1  ;;  %s1499_s7 = smov 64   ;;  %s1500_s6 = smov 80   ;;  %v621_v46 = vsel %vm412_vm3, %v342_v45, 0  ;;  %v343_v47 = vld [vmem:[#allocation7 + $0x4] sm:$0xf] }
  0x6d   : > { %1152 = vmatprep.subr.bf16.mxu0 %v1493_v0  ;;  %s1501_s30 = smov 112   ;;  %s1502_s15 = smov 72   ;;  %v575_v48 = vsel %vm412_vm3, %v343_v47, 0 }
  0x6e   : > { %s1503_s16 = smov 48   ;;  %s1504_s9 = smov 104  }
  0x6f   : > { %s1505_s29 = smov 40   ;;  %s1120_s26 = sshll.u32 %s1558_s22, 7 }
  0x70   : > { %1153 = vmatpush3.bf16.msra.mxu0 %v1313_v2  ;;  %s988_s22 = scalar_lea.sflag [#allocation4], %s1706_s12  ;;  %p1888_p0 = scmp.ne.s32.totalorder %s1883_s23, 0 }
  0x71   : > { %1164 = vmatprep.subr.bf16.mxu0 %v1493_v0 }
  0x73   : > { %1155 = vmatmul.mubr.msk.bf16.vlgmr.msra.gmra.mrb[0].mxu0 %vm295_vm1, %v271_v4 }
  0x74   : > { %1166 = vmatprep.mubr.msk.bf16.mxu0 %vm1494_vm0, %v1493_v0 }
 0x146   : > { %v333_v6 = vpop.f32.mrb[0].mxu0 }
 0x147   : > { %v334_v7 = vadd.f32 %v1102_v5, %v333_v6  ;;  %v1156_v8 = vpop.f32.mrb[1].mxu0 }
 0x148   : > { %v336_v9 = vpop.f32.mrb[2].mxu0 }
 0x149   : > { %v339_v10 = vmul.f32 0.17677669, %v334_v7  ;;  %v1734_v11 = vpack.c.bf16 %v334_v7, %v334_v7  ;;  %v1157_v12 = vpop.f32.mrb[3].mxu0 }
 0x14b   : > { %v1736_v13 = vpack.c.bf16 %v339_v10, %v339_v10  ;;  %348 = vrot.lane.b32.xlu0 %v1734_v11, %s1495_s8  ;;  %s268_s8 = scalar_lea.vmem [#allocation8], %s1098_s13 }
 0x14d   : > { %460 = vrot.lane.b32.xlu1 %v1736_v13, %s1496_s10  ;;  %s1001_s10 = sshll.u32 %s268_s8, 4  ;;  %s1826_s10 = int_to_ptr.vmem [resolvable:$true] %s1001_s10 }
 0x14e   : > { %s1416_s13 = scalar_lea.vmem %s1826_s10, 128 }
 0x14f   : > { %462 = vrot.lane.b32.xlu0 %v1734_v11, %s1497_s11  ;;  %p1417_p11 = scmp.ne.s32.totalorder %s1826_s10, %s1416_s13 }
 0x151   : > { %p1418_p1 = pnand %p1417_p11, %p1888_p0 }
 0x153   : > { %p1419_p3 = pneg %p1418_p1 }
 0x1bd   : > { %v349_v14 = vpop.permute.xlu0 %348 }
 0x1be   : > { %v355_v15 = vsel %vm350_vm2, %v349_v14, 0 }
 0x1bf   : > { %1159 = vmatpush3.bf16.xpose.msra.mxu1 %v355_v15  ;;  %v461_v18 = vpop.permute.xlu1 %460 }
 0x1c0   : > { %1170 = vmatprep.subr.bf16.mxu1 %v1493_v0 }
 0x1c1   : > { %v463_v16 = vpop.permute.xlu0 %462 }
 0x1c2   : > { %v468_v17 = vsel %vm350_vm2, %v463_v16, 0 }
 0x1c6   : > { %1161 = vmatmul.mubr.msk.bf16.vlgmr.msra.gmra.mrb[0].mxu1 %vm350_vm2, %v1736_v13 }
 0x1c7   : > { %1171 = vmatpush3.bf16.xpose.msra.mxu1 %v468_v17  ;;  %1172 = vmatprep.mubr.msk.bf16.mxu1 %vm1494_vm0, %v1493_v0 }
 0x1c8   : > { %1182 = vmatprep.subr.bf16.mxu1 %v1493_v0 }
 0x1ce   : > { %1173 = vmatmul.mubr.msk.bf16.vlgmr.msra.gmra.mrb[4].mxu1 %vm350_vm2, %v461_v18 }
 0x1cf   : > { %1184 = vmatprep.mubr.msk.bf16.mxu1 %vm1494_vm0, %v1493_v0  ;;  %1183 = vmatpush3.bf16.msra.mxu1 %v575_v48 }
 0x1d0   : > { %1194 = vmatprep.subr.bf16.mxu1 %v1493_v0 }
 0x299   : > { %v391_v19 = vpop.f32.mrb[0].mxu1 }
 0x29a   : > { %v1162_v20 = vpop.f32.mrb[1].mxu1  ;;  %v397_v21 = vsel %vm350_vm2, %v391_v19, -inf }
 0x29b   : > { %398 = vmax.xlane.f32.xlu1 %v397_v21  ;;  %v394_v22 = vpop.f32.mrb[2].mxu1 }
 0x29c   : > { %v1163_v23 = vpop.f32.mrb[3].mxu1 }
 0x2a1   : > { %v504_v24 = vpop.f32.mrb[4].mxu1 }
 0x2a2   : > { %v1174_v25 = vpop.f32.mrb[5].mxu1  ;;  %v510_v26 = vsel %vm350_vm2, %v504_v24, -inf }
 0x2a3   : > { %511 = vmax.xlane.f32.xlu0 %v510_v26  ;;  %v507_v27 = vpop.f32.mrb[6].mxu1 }
 0x2a4   : > { %v1175_v28 = vpop.f32.mrb[7].mxu1 }
 0x2ac   : > { %520 = vrot.lane.b32.xlu1 %v1734_v11, %s1498_s28 }
 0x2b9   : > { %407 = vrot.lane.b32.xlu0 %v1734_v11, %s1499_s7  ;;  %s1824_s7 = scalar_lea.hbm %s1874_s5, %s1120_s26 }
 0x2bd   : > { %665 = vrot.lane.b32.xlu0 %v1734_v11, %s1500_s6  ;;  %s1506_s6 = smov [#allocation8]  }
 0x2c1   : > { %663 = vrot.lane.b32.xlu0 %v1736_v13, %s1501_s30  ;;  %s1420_s30 = sshll.u32 %s1506_s6, 4  ;;  %s1421_s30 = int_to_ptr.vmem [resolvable:$false] %s1420_s30 }
 0x2c2   : > { %p1423_p7 = scmp.lt.s32.totalorder %s1826_s10, %s1421_s30 }
 0x328   : > { %v399_v29 = vpop.xlane.xlu1 %398 }
 0x329   : > { %v400_v30 = vsub.f32 %v391_v19, %v399_v29 }
 0x32b   : > { %v401_v31 = vmul.f32 1.442695, %v400_v30 }
 0x32c   : > { %v521_v38 = vpop.permute.xlu1 %520 }
 0x32d   : > { %1314 = vpow2.f32 %v401_v31  ;;  %v526_v41 = vsel %vm412_vm3, %v521_v38, 0  ;;  %v344_v31 = vld [vmem:[#allocation7 + $0x8] sm:$0xf] }
 0x330   : > { %v512_v32 = vpop.xlane.xlu0 %511 }
 0x331   : > { %v513_v33 = vsub.f32 %v504_v24, %v512_v32  ;;  %v778_v32 = vsel %vm412_vm3, %v344_v31, 0 }
 0x333   : > { %v514_v34 = vmul.f32 1.442695, %v513_v33 }
 0x334   : > { %v408_v35 = vpop.permute.xlu0 %407 }
 0x335   : > { %1316 = vpow2.f32 %v514_v34  ;;  %v414_v36 = vsel %vm412_vm3, %v408_v35, 0 }
 0x336   : > { %1165 = vmatpush3.bf16.msra.mxu0 %v414_v36 }
 0x337   : > { %v1315_v37 = vpop.eup %1314  ;;  %1176 = vmatprep.subr.bf16.mxu0 %v1493_v0 }
 0x338   : > { %v403_v39 = vsel %vm350_vm2, %v1315_v37, 0.0  ;;  %v406_v40 = vpack.c.bf16 %v1315_v37, %v1315_v37  ;;  %v666_v49 = vpop.permute.xlu0 %665 }
 0x339   : > { %404 = vadd.xlane.f32.xlu0 %v403_v39  ;;  %v671_v4 = vsel %vm350_vm2, %v666_v49, 0 }
 0x33a   : > { %1167 = vmatmul.mubr.msk.bf16.vlgmr.msra.gmra.mrb[4].mxu0 %vm350_vm2, %v406_v40 }
 0x33b   : > { %1177 = vmatpush3.bf16.msra.mxu0 %v526_v41  ;;  %1178 = vmatprep.mubr.msk.bf16.mxu0 %vm1494_vm0, %v1493_v0 }
 0x33c   : > { %1188 = vmatprep.subr.bf16.mxu0 %v1493_v0  ;;  %v664_v50 = vpop.permute.xlu0 %663 }
 0x33f   : > { %v1317_v42 = vpop.eup %1316 }
 0x340   : > { %v516_v43 = vsel %vm350_vm2, %v1317_v42, 0.0  ;;  %v519_v44 = vpack.c.bf16 %v1317_v42, %v1317_v42 }
 0x341   : > { %517 = vadd.xlane.f32.xlu1 %v516_v43 }
 0x342   : > { %1179 = vmatmul.mubr.msk.bf16.vlgmr.msra.gmra.mrb[8].mxu0 %vm350_vm2, %v519_v44 }
 0x343   : > { %1190 = vmatprep.mubr.msk.bf16.mxu0 %vm1494_vm0, %v1493_v0  ;;  %1189 = vmatpush3.bf16.msra.mxu0 %v621_v46 }
 0x344   : > { %1200 = vmatprep.subr.bf16.mxu0 %v1493_v0 }
 0x34f   : > { %823 = vrot.lane.b32.xlu0 %v1734_v11, %s1502_s15  ;;  %s1422_s15 = scalar_lea.vmem %s1421_s30, 256 }
 0x350   : > { %p1424_p9 = scmp.lt.s32.totalorder %s1422_s15, %s1416_s13 }
 0x352   : > { %p1425_p12 = por %p1424_p9, %p1423_p7 }
 0x354   : > { %p1426_p2 = pnand %p1425_p12, %p1419_p3 }
 0x3c6   : > { %v405_v51 = vpop.xlane.xlu0 %404 }
 0x3c7   : > { %1318 = vrcp.f32 %v405_v51 }
 0x3ca   : > { %v824_v27 = vpop.permute.xlu0 %823 }
 0x3cb   : > { %v829_v30 = vsel %vm350_vm2, %v824_v27, 0 }
 0x3ce   : > { %v518_v52 = vpop.xlane.xlu1 %517 }
 0x3cf   : > { %1320 = vrcp.f32 %v518_v52 }
 0x3d1   : > { %v1319_v53 = vpop.eup %1318 }
 0x3d9   : > { %v1321_v60 = vpop.eup %1320 }
 0x40d   : > { %v450_v54 = vpop.f32.mrb[4].mxu0 }
 0x40e   : > { %v457_v55 = vmul.f32 %v1319_v53, %v450_v54  ;;  %v1168_v56 = vpop.f32.mrb[5].mxu0 }
 0x40f   : > { %v453_v57 = vpop.f32.mrb[6].mxu0 }
 0x410   : > { %v458_v58 = vpack.c.bf16 %v457_v55, %v457_v55  ;;  %v1169_v59 = vpop.f32.mrb[7].mxu0  ;;  %v345_v57 = vld [vmem:[#allocation7 + $0xc] sm:$0xf] }
 0x412   : > { %1191 = vmatmul.mubr.msk.bf16.vlgmr.msra.gmra.mrb[12].mxu0 %vm350_vm2, %v458_v58  ;;  %v936_v58 = vsel %vm412_vm3, %v345_v57, 0 }
 0x413   : > { %1202 = vmatprep.mubr.msk.bf16.mxu0 %vm1494_vm0, %v1493_v0 }
 0x415   : > { %v562_v61 = vpop.f32.mrb[8].mxu0 }
 0x416   : > { %v569_v62 = vmul.f32 %v1321_v60, %v562_v61  ;;  %v1180_v63 = vpop.f32.mrb[9].mxu0 }
 0x417   : > { %v565_v1 = vpop.f32.mrb[10].mxu0 }
 0x418   : > { %v570_v2 = vpack.c.bf16 %v569_v62, %v569_v62  ;;  %v1181_v3 = vpop.f32.mrb[11].mxu0 }
 0x41a   : > { %1185 = vmatmul.mubr.msk.bf16.vlgmr.msra.gmra.mrb[8].mxu1 %vm350_vm2, %v570_v2 }
 0x41b   : > { %1195 = vmatpush3.bf16.xpose.msra.mxu1 %v671_v4  ;;  %1196 = vmatprep.mubr.msk.bf16.mxu1 %vm1494_vm0, %v1493_v0  ;;  %v1118_v4 = vld [vmem:[%s1873_s4] ss:$0 sm:$0xff] }
 0x41c   : > { %1206 = vmatprep.subr.bf16.mxu1 %v1493_v0 }
 0x422   : > { %1197 = vmatmul.mubr.msk.bf16.vlgmr.msra.gmra.mrb[12].mxu1 %vm350_vm2, %v664_v50 }
 0x423   : > { %1208 = vmatprep.mubr.msk.bf16.mxu1 %vm1494_vm0, %v1493_v0  ;;  %1207 = vmatpush3.bf16.msra.mxu1 %v778_v32 }
 0x424   : > { %1218 = vmatprep.subr.bf16.mxu1 %v1493_v0 }
 0x4e5   : > { %v657_v5 = vpop.f32.mrb[12].mxu0 }
 0x4e6   : > { %v1192_v6 = vpop.f32.mrb[13].mxu0 }
 0x4e7   : > { %v660_v7 = vpop.f32.mrb[14].mxu0 }
 0x4e8   : > { %v1193_v8 = vpop.f32.mrb[15].mxu0 }
 0x4ed   : > { %v611_v9 = vpop.f32.mrb[8].mxu1 }
 0x4ee   : > { %v1786_v10 = vadd.f32 %v657_v5, %v611_v9  ;;  %v1186_v12 = vpop.f32.mrb[9].mxu1 }
 0x4ef   : > { %v614_v14 = vpop.f32.mrb[10].mxu1 }
 0x4f0   : > { %v1187_v15 = vpop.f32.mrb[11].mxu1 }
 0x4f5   : > { %v707_v16 = vpop.f32.mrb[12].mxu1 }
 0x4f6   : > { %v1198_v17 = vpop.f32.mrb[13].mxu1  ;;  %v713_v18 = vsel %vm350_vm2, %v707_v16, -inf }
 0x4f7   : > { %714 = vmax.xlane.f32.xlu1 %v713_v18  ;;  %v710_v19 = vpop.f32.mrb[14].mxu1 }
 0x4f8   : > { %v1199_v20 = vpop.f32.mrb[15].mxu1 }
 0x508   : > { %723 = vrot.lane.b32.xlu1 %v1734_v11, %s1503_s16 }
 0x50c   : > { %821 = vrot.lane.b32.xlu1 %v1736_v13, %s1504_s9 }
 0x584   : > { %v715_v21 = vpop.xlane.xlu1 %714 }
 0x585   : > { %v716_v22 = vsub.f32 %v707_v16, %v715_v21 }
 0x587   : > { %v717_v23 = vmul.f32 1.442695, %v716_v22 }
 0x588   : > { %v724_v24 = vpop.permute.xlu1 %723 }
 0x589   : > { %1322 = vpow2.f32 %v717_v23  ;;  %v729_v25 = vsel %vm412_vm3, %v724_v24, 0 }
 0x58a   : > { %1201 = vmatpush3.bf16.msra.mxu0 %v729_v25 }
 0x58b   : > { %1212 = vmatprep.subr.bf16.mxu0 %v1493_v0 }
 0x58c   : > { %v822_v13 = vpop.permute.xlu1 %821 }
 0x593   : > { %v1323_v26 = vpop.eup %1322 }
 0x594   : > { %v719_v28 = vsel %vm350_vm2, %v1323_v26, 0.0  ;;  %v722_v29 = vpack.c.bf16 %v1323_v26, %v1323_v26 }
 0x595   : > { %720 = vadd.xlane.f32.xlu1 %v719_v28 }
 0x596   : > { %1203 = vmatmul.mubr.msk.bf16.vlgmr.msra.gmra.mrb[16].mxu0 %vm350_vm2, %v722_v29 }
 0x597   : > { %1213 = vmatpush3.bf16.xpose.msra.mxu0 %v829_v30  ;;  %1214 = vmatprep.mubr.msk.bf16.mxu0 %vm1494_vm0, %v1493_v0 }
 0x598   : > { %1224 = vmatprep.subr.bf16.mxu0 %v1493_v0 }
 0x59e   : > { %1215 = vmatmul.mubr.msk.bf16.vlgmr.msra.gmra.mrb[20].mxu0 %vm350_vm2, %v822_v13 }
 0x59f   : > { %1226 = vmatprep.mubr.msk.bf16.mxu0 %vm1494_vm0, %v1493_v0  ;;  %1225 = vmatpush3.bf16.msra.mxu0 %v936_v58 }
 0x622   : > { %v721_v33 = vpop.xlane.xlu1 %720 }
 0x623   : > { %1324 = vrcp.f32 %v721_v33 }
 0x62d   : > { %v1325_v34 = vpop.eup %1324 }
 0x669   : > { %v765_v35 = vpop.f32.mrb[16].mxu0 }
 0x66a   : > { %v772_v36 = vmul.f32 %v1325_v34, %v765_v35  ;;  %v1204_v37 = vpop.f32.mrb[17].mxu0 }
 0x66b   : > { %v768_v38 = vpop.f32.mrb[18].mxu0 }
 0x66c   : > { %v773_v39 = vpack.c.bf16 %v772_v36, %v772_v36  ;;  %v1205_v40 = vpop.f32.mrb[19].mxu0 }
 0x66e   : > { %1209 = vmatmul.mubr.msk.bf16.vlgmr.msra.gmra.mrb[16].mxu1 %vm350_vm2, %v773_v39 }
 0x66f   : > { %1220 = vmatprep.mubr.msk.bf16.mxu1 %vm1494_vm0, %v1493_v0 }
 0x671   : > { %v865_v41 = vpop.f32.mrb[20].mxu0 }
 0x672   : > { %v1216_v42 = vpop.f32.mrb[21].mxu0  ;;  %v871_v43 = vsel %vm350_vm2, %v865_v41, -inf }
 0x673   : > { %872 = vmax.xlane.f32.xlu0 %v871_v43  ;;  %v868_v44 = vpop.f32.mrb[22].mxu0 }
 0x674   : > { %v1217_v45 = vpop.f32.mrb[23].mxu0 }
 0x689   : > { %881 = vrot.lane.b32.xlu0 %v1734_v11, %s1505_s29 }
 0x700   : > { %v873_v46 = vpop.xlane.xlu0 %872 }
 0x701   : > { %v874_v47 = vsub.f32 %v865_v41, %v873_v46 }
 0x703   : > { %v875_v48 = vmul.f32 1.442695, %v874_v47 }
 0x704   : > { %v882_v49 = vpop.permute.xlu0 %881 }
 0x705   : > { %1326 = vpow2.f32 %v875_v48  ;;  %v887_v50 = vsel %vm412_vm3, %v882_v49, 0 }
 0x706   : > { %1219 = vmatpush3.bf16.msra.mxu1 %v887_v50 }
 0x70f   : > { %v1327_v51 = vpop.eup %1326 }
 0x710   : > { %v877_v0 = vsel %vm350_vm2, %v1327_v51, 0.0  ;;  %v880_v52 = vpack.c.bf16 %v1327_v51, %v1327_v51 }
 0x711   : > { %878 = vadd.xlane.f32.xlu1 %v877_v0 }
 0x712   : > { %1221 = vmatmul.mubr.msk.bf16.vlgmr.msra.gmra.mrb[20].mxu1 %vm350_vm2, %v880_v52 }
 0x741   : > { %v814_v53 = vpop.f32.mrb[16].mxu1 }
 0x742   : > { %v820_v54 = vadd.f32 %v814_v53, %v1786_v10  ;;  %v1210_v55 = vpop.f32.mrb[17].mxu1 }
 0x743   : > { %v817_v11 = vpop.f32.mrb[18].mxu1 }
 0x744   : > { %v1211_v56 = vpop.f32.mrb[19].mxu1 }
 0x79e   : > { %v879_v59 = vpop.xlane.xlu1 %878 }
 0x79f   : > { %1328 = vrcp.f32 %v879_v59 }
 0x7a9   : > { %v1329_v60 = vpop.eup %1328 }
 0x7e5   : > { %v923_v61 = vpop.f32.mrb[20].mxu1 }
 0x7e6   : > { %v930_v62 = vmul.f32 %v1329_v60, %v923_v61  ;;  %v1222_v63 = vpop.f32.mrb[21].mxu1 }
 0x7e7   : > { %v926_v1 = vpop.f32.mrb[22].mxu1 }
 0x7e8   : > { %v931_v2 = vpack.c.bf16 %v930_v62, %v930_v62  ;;  %v1223_v3 = vpop.f32.mrb[23].mxu1 }
 0x7ea   : > { %1227 = vmatmul.mubr.msk.bf16.vlgmr.msra.gmra.mrb[24].mxu0 %vm350_vm2, %v931_v2 }
 0x8bd   : > { %v972_v5 = vpop.f32.mrb[24].mxu0 }
 0x8be   : > { %v978_v6 = vadd.f32 %v972_v5, %v820_v54  ;;  %v1228_v7 = vpop.f32.mrb[25].mxu0 }
 0x8bf   : > { %v975_v8 = vpop.f32.mrb[26].mxu0 }
 0x8c0   : > { %v985_v9 = vadd.f32 %v1118_v4, %v978_v6  ;;  %v1229_v10 = vpop.f32.mrb[27].mxu0 }
 0x8c2   : > { %986 = vst.msk [vmem:[%s268_s8] sm:$0xff] %vm295_vm1, %v985_v9 }
 0x8c3   : > { %1429 = shalt.err (!%p1426_p2)
}
 0x8c4   : > { %s1430_s12 = scalar_lea.hbm %s1824_s7, 128  ;;  %s1434_s29 = scalar_lea.hbm %s1874_s5, 256 }
 0x8c5   : > { %p1431_p13 = scmp.ne.s32.totalorder %s1824_s7, %s1430_s12  ;;  %p1435_p4 = scmp.lt.u32.totalorder %s1824_s7, %s1874_s5 }
 0x8c6   : > { %p1436_p5 = scmp.lt.u32.totalorder %s1434_s29, %s1430_s12  ;;  %p1438_p11 = scmp.lt.u32.totalorder %s1430_s12, %s1824_s7 }
 0x8c7   : > { %p1432_p6 = pnand %p1431_p13, %p1888_p0 }
 0x8c8   : > { %p1437_p8 = por %p1436_p5, %p1435_p4 }
 0x8c9   : > { %p1433_p10 = pneg %p1432_p6 }
 0x8ca   : > { %p1439_p1 = por %p1438_p11, %p1437_p8 }
 0x8cc   : > { %p1440_p3 = pnand %p1439_p1, %p1433_p10 }
 0x8ce   : > { %1443 = shalt.err (!%p1440_p3)
}
 0x8cf   : > { %1240 = dma.vmem_to_hbm [thread:$0]  (%p1888_p0), %s1826_s10, 128, %s1824_s7, %s988_s22  }
 0x8d0 PF: > { %s1013_s26 = sand.u32 1, %s1474_s18   ;;  %p1889_p7 = scmp.ne.s32.totalorder %s1879_s25, 0 }
 0x8d1   : > { %p1890_p9 = scmp.ge.s32.totalorder %s1486_s21, 2  ;;  %s1014_s8 = scalar_lea.sflag [#allocation4], %s1013_s26 }
 0x8d3   : > { %p1254_p12 = pnand %p1890_p9, %p1889_p7 }
 0x8d5   : > { %1469 = dma.done.wait (!%p1254_p12), %s1014_s8, 128  }
 0x8d6   : > { %1471 = vsyncadd (!%p1254_p12), %s1014_s8, 4294967168  ;;  %p19_p2 = scmp.ge.s32.totalorder %s1647_s14, 4   ;;  %s1891_s18 = smov %s1478_s19 }
 0x8d7   : > { %s1892_s19 = smov %s1482_s20  ;;  %s1893_s20 = smov %s1663_s27 }
 0x8d8   : > { %s1894_s21 = smov %s1647_s14  ;;  %21 = sbr.rel (!%p19_p2) target bundleno = 6 (0x6), region = 93 }
 0x8df   :  { %1019 = vsyncpa [#allocation3], 1 }
 0x8e0   :  { %1021 = vsyncpa [#allocation3 + $0x1], 1 }
 0x8e1   :  { %1022 = vsyncpa [#allocation6], 1 }
 0x8e2   :  { %1023 = vsyncpa [#allocation4], 1 }
 0x8e3   :  { %1025 = vsyncpa [#allocation4 + $0x1], 1 }

</bundles_post_ra>
